<compile_context>
chip_gen: v6e
topology: v6e:2x2x1
jax: 0.10.0
libtpu: 0.0.40
codegen_flags: <defaults>
</compile_context>

<pallas_src>
import functools

import jax
import jax.numpy as jnp
from jax import lax
from jax.experimental import pallas as pl
from jax.experimental.pallas import tpu as pltpu

LAMDA = 0.7       # `lamda` global from the reference script
THRESHOLD = 0.5   # `threshold` global from the reference script


def _loss_kernel(patches_ref, wfeat_ref, camw_ref, logits_ref, labels_ref, loss_ref,
                 *, tb, n_pos, c_pad, threshold, lamda):
    # --- stand-in backbone: project image patches -> "layer4" activations (MXU) ---
    # TODO(synk): the original module runs a loaded ResNet50 checkpoint + GradCAM
    # backward hooks; without `best_model.pt` the backbone is a deterministic patch
    # projection (bf16 operands, f32 accumulation) and the GradCAM channel weights
    # are a deterministic per-class table.
    feats = jnp.maximum(
        jnp.dot(patches_ref[...], wfeat_ref[...],
                preferred_element_type=jnp.float32), 0.0)             # [TB*P, C_pad] f32

    # --- GradCAM map: ReLU(sum_c w_c * A_c), min/max normalized per image ---------
    # camw_ref is the per-position channel-weight slab [TB*P, C_pad] (expanded in
    # the wrapper), so the multiply stays 2-D and lane-dense. The reshape below
    # only splits the leading (sublane) dim with the 128-lane axis unchanged, so
    # it is a zero-copy, tile-preserving view.
    weighted = feats * camw_ref[...]                                  # [TB*P, C_pad]
    cam = jnp.sum(weighted.reshape(tb, n_pos, c_pad), axis=-1)        # [TB, P]
    cam = jnp.maximum(cam, 0.0)
    cam = cam - jnp.min(cam, axis=-1, keepdims=True)
    inv_max = pl.reciprocal(jnp.max(cam, axis=-1, keepdims=True) + 1e-7, approx=True)
    cam = cam * inv_max
    # TODO(synk): pytorch_grad_cam bilinearly resizes the CAM to input resolution;
    # the red-area ratio is computed at feature-map resolution here instead.

    # --- red-area ratio over the TOP half of the cam ------------------------------
    half = n_pos // 2   # row-major (h, w) => first P//2 positions are the top rows
    pos = lax.broadcasted_iota(jnp.int32, cam.shape, 1)
    red = jnp.sum(jnp.where(jnp.logical_and(pos < half, cam > threshold), 1.0, 0.0),
                  axis=-1, keepdims=True)                             # [TB, 1]
    red_ratio = red * (1.0 / float(half))

    labels_i = labels_ref[...]                                        # [TB, 1] int32
    loss_attent = (1.0 - red_ratio) * labels_i.astype(jnp.float32)    # [TB, 1]

    # --- cross entropy on the provided logits -------------------------------------
    logits = logits_ref[...]                                          # [TB, NC] f32
    m = jnp.max(logits, axis=-1, keepdims=True)
    lse = m + jnp.log(jnp.sum(jnp.exp(logits - m), axis=-1, keepdims=True))
    cls = lax.broadcasted_iota(jnp.int32, logits.shape, 1)
    tgt = jnp.sum(jnp.where(cls == labels_i, logits, 0.0), axis=-1, keepdims=True)
    loss_ce = lse - tgt                                               # [TB, 1]

    loss_ref[...] = lamda * loss_ce + (1.0 - lamda) * loss_attent


def _round_up(x, m):
    return pl.cdiv(x, m) * m


def custom_loss_np(images, outputs, labels, predictions, w_feat, w_cam_table,
                   *, patch=4, threshold=THRESHOLD, lamda=LAMDA, tile_b=None):
    """images: [B,3,H,W] f32 (NCHW); outputs: [B,NC] logits; labels/predictions: [B] int."""
    B, c_img, H, W = images.shape
    h, w = H // patch, W // patch
    P = h * w
    K = c_img * patch * patch
    C = w_feat.shape[1]
    NC = outputs.shape[1]

    K_pad = _round_up(K, 128)   # lane-dense contraction dim for the MXU
    C_pad = _round_up(C, 128)   # lane-dense output / channel dim

    # Batch tile: keep TB*P a multiple of 8 (sublanes) and the double-buffered
    # blocks (patches bf16 + camw f32 + wfeat) tiny relative to v7x's 64 MiB VMEM.
    if tile_b is None:
        tile_b = B if B <= 8 else 8
    assert B % tile_b == 0, "batch must be divisible by the batch tile"
    assert (tile_b * P) % 8 == 0, "TB*P must be a multiple of 8 (sublane tiling)"

    # glue: patchify NCHW -> [B*P, K_pad] in bf16 (halves the pre-kernel HBM
    # transpose traffic and feeds the MXU at its bf16 rate); P is row-major over
    # (h, w) so the first P//2 positions are exactly the top half rows.
    x = images.astype(jnp.bfloat16).reshape(B, c_img, h, patch, w, patch)
    x = x.transpose(0, 2, 4, 1, 3, 5).reshape(B * P, K)
    x = jnp.pad(x, ((0, 0), (0, K_pad - K)))                          # [B*P, K_pad] bf16

    wf = jnp.pad(w_feat.astype(jnp.float32),
                 ((0, K_pad - K), (0, C_pad - C))).astype(jnp.bfloat16)  # [K_pad, C_pad]

    # glue: per-sample GradCAM channel weights selected by the predicted class,
    # zero-padded on C and expanded to one row per spatial position so the kernel
    # multiply stays 2-D / lane-dense (kept f32: elementwise path stays f32).
    cam_w = w_cam_table[predictions].astype(jnp.float32)              # [B, C]
    cam_w = jnp.pad(cam_w, ((0, 0), (0, C_pad - C)))                  # [B, C_pad]
    cam_w = jnp.repeat(cam_w, P, axis=0)                              # [B*P, C_pad]

    logits = outputs.astype(jnp.float32)                              # [B, NC]
    labels2d = labels.astype(jnp.int32).reshape(B, 1)                 # [B, 1]

    kernel = functools.partial(_loss_kernel, tb=tile_b, n_pos=P, c_pad=C_pad,
                               threshold=threshold, lamda=lamda)
    losses = pl.pallas_call(
        kernel,
        out_shape=jax.ShapeDtypeStruct((B, 1), jnp.float32),
        grid=(B // tile_b,),
        in_specs=[
            pl.BlockSpec((tile_b * P, K_pad), lambda i: (i, 0)),      # patch slab
            pl.BlockSpec((K_pad, C_pad), lambda i: (0, 0)),           # projection weights
            pl.BlockSpec((tile_b * P, C_pad), lambda i: (i, 0)),      # cam weight slab
            pl.BlockSpec((tile_b, NC), lambda i: (i, 0)),             # logits
            pl.BlockSpec((tile_b, 1), lambda i: (i, 0)),              # labels
        ],
        out_specs=pl.BlockSpec((tile_b, 1), lambda i: (i, 0)),        # per-sample loss
        compiler_params=pltpu.CompilerParams(
            dimension_semantics=("parallel",),        # independent batch tiles (v7x: 2 TCs)
            vmem_limit_bytes=32 * 1024 * 1024),       # safe on v5e/v6e/v7x; blocks are tiny
    )(x, wf, cam_w, logits, labels2d)

    return jnp.mean(losses)


if __name__ == "__main__":
    key = jax.random.PRNGKey(0)
    k_img, k_out, k_lbl, k_prd, k_wf, k_wc = jax.random.split(key, 6)

    B, C_IMG, H, W = 16, 3, 32, 32     # small NCHW images, B divisible by the batch tile
    PATCH = 4                          # -> 8x8 feature map, P = 64 (even h: clean top half)
    C_FEAT = 32                        # stand-in "layer4" channel count (padded to 128)
    NC = 2                             # binary task (labels also weight loss_attent)

    images = jax.random.normal(k_img, (B, C_IMG, H, W), dtype=jnp.float32)
    outputs = jax.random.normal(k_out, (B, NC), dtype=jnp.float32)          # logits
    labels = jax.random.randint(k_lbl, (B,), 0, NC, dtype=jnp.int32)
    predictions = jax.random.randint(k_prd, (B,), 0, NC, dtype=jnp.int32)

    # deterministic synthetic "parameters"
    K = C_IMG * PATCH * PATCH
    w_feat = jax.random.normal(k_wf, (K, C_FEAT), dtype=jnp.float32) * 0.1
    w_cam_table = jax.random.normal(k_wc, (NC, C_FEAT), dtype=jnp.float32)

    loss = custom_loss_np(images, outputs, labels, predictions, w_feat, w_cam_table,
                          patch=PATCH)
    jax.block_until_ready(loss)
    assert loss.shape == () and jnp.isfinite(loss)
    print("KERNEL_OK")
</pallas_src>

<mosaic_0001>
module attributes {stable_mosaic.version = 11 : i64} {
  func.func @_loss_kernel(%arg0: i32, %arg1: memref<512x128xbf16, #tpu.memory_space<vmem>>, %arg2: memref<128x128xbf16, #tpu.memory_space<vmem>>, %arg3: memref<512x128xf32, #tpu.memory_space<vmem>>, %arg4: memref<8x2xf32, #tpu.memory_space<vmem>>, %arg5: memref<8x1xi32, #tpu.memory_space<vmem>>, %arg6: memref<8x1xf32, #tpu.memory_space<vmem>>) attributes {dimension_semantics = [#tpu.dimension_semantics<parallel>], iteration_bounds = array<i64: 2>, scalar_prefetch = 0 : i64, scratch_operands = 0 : i64, tpu.core_type = #tpu.core_type<tc>, window_params = [{transform_indices = @transform_0, window_bounds = array<i64: 512, 128>}, {pipeline_mode = #tpu.pipeline_mode<synchronous>, transform_indices = @transform_1, window_bounds = array<i64: 128, 128>}, {transform_indices = @transform_2, window_bounds = array<i64: 512, 128>}, {transform_indices = @transform_3, window_bounds = array<i64: 8, 2>}, {transform_indices = @transform_4, window_bounds = array<i64: 8, 1>}, {transform_indices = @transform_5, window_bounds = array<i64: 8, 1>}]} {
    %c0 = arith.constant 0 : index
    %c0_0 = arith.constant 0 : index
    %0 = vector.load %arg1[%c0, %c0_0] : memref<512x128xbf16, #tpu.memory_space<vmem>>, vector<512x128xbf16>
    %c0_1 = arith.constant 0 : index
    %c0_2 = arith.constant 0 : index
    %1 = vector.load %arg2[%c0_1, %c0_2] : memref<128x128xbf16, #tpu.memory_space<vmem>>, vector<128x128xbf16>
    %cst = arith.constant dense<0.000000e+00> : vector<512x128xf32>
    %2 = tpu.matmul %0, %1, %cst {dimension_numbers = #tpu.dot_dimension_numbers<[1], [0], [0], [1], [0, 0, 1, 1], [], []>} : vector<512x128xbf16>, vector<128x128xbf16>, vector<512x128xf32> -> vector<512x128xf32>
    %cst_3 = arith.constant 0.000000e+00 : f32
    %3 = vector.broadcast %cst_3 : f32 to vector<512x128xf32>
    %4 = arith.maximumf %2, %3 : vector<512x128xf32>
    %c0_4 = arith.constant 0 : index
    %c0_5 = arith.constant 0 : index
    %5 = vector.load %arg3[%c0_4, %c0_5] : memref<512x128xf32, #tpu.memory_space<vmem>>, vector<512x128xf32>
    %6 = arith.mulf %4, %5 : vector<512x128xf32>
    %7 = vector.shape_cast %6 : vector<512x128xf32> to vector<8x64x128xf32>
    %cst_6 = arith.constant dense<0.000000e+00> : vector<8x64xf32>
    %8 = vector.multi_reduction <add>, %7, %cst_6 [2] : vector<8x64x128xf32> to vector<8x64xf32>
    %cst_7 = arith.constant 0.000000e+00 : f32
    %9 = vector.broadcast %cst_7 : f32 to vector<8x64xf32>
    %10 = arith.maximumf %8, %9 : vector<8x64xf32>
    %cst_8 = arith.constant dense<0x7F800000> : vector<8xf32>
    %11 = vector.multi_reduction <minimumf>, %10, %cst_8 [1] : vector<8x64xf32> to vector<8xf32>
    %12 = vector.shape_cast %11 : vector<8xf32> to vector<8x1xf32>
    %13 = vector.broadcast %12 : vector<8x1xf32> to vector<8x64xf32>
    %14 = arith.subf %10, %13 : vector<8x64xf32>
    %cst_9 = arith.constant dense<0xFF800000> : vector<8xf32>
    %15 = vector.multi_reduction <maximumf>, %14, %cst_9 [1] : vector<8x64xf32> to vector<8xf32>
    %16 = vector.shape_cast %15 : vector<8xf32> to vector<8x1xf32>
    %cst_10 = arith.constant 1.000000e-07 : f32
    %17 = vector.broadcast %cst_10 : f32 to vector<8x1xf32>
    %18 = arith.addf %16, %17 : vector<8x1xf32>
    %19 = tpu.reciprocal %18 {approx = true} : vector<8x1xf32> -> vector<8x1xf32>
    %20 = vector.broadcast %19 : vector<8x1xf32> to vector<8x64xf32>
    %21 = arith.mulf %14, %20 : vector<8x64xf32>
    %22 = tpu.iota {dimensions = array<i32: 1>} : vector<8x64xi32>
    %c32_i32 = arith.constant 32 : i32
    %23 = vector.broadcast %c32_i32 : i32 to vector<8x64xi32>
    %24 = arith.cmpi slt, %22, %23 : vector<8x64xi32>
    %cst_11 = arith.constant 5.000000e-01 : f32
    %25 = vector.broadcast %cst_11 : f32 to vector<8x64xf32>
    %26 = arith.cmpf ogt, %21, %25 : vector<8x64xf32>
    %27 = arith.andi %24, %26 : vector<8x64xi1>
    %cst_12 = arith.constant 1.000000e+00 : f32
    %cst_13 = arith.constant 0.000000e+00 : f32
    %28 = vector.broadcast %cst_12 : f32 to vector<8x64xf32>
    %29 = vector.broadcast %cst_13 : f32 to vector<8x64xf32>
    %30 = arith.select %27, %28, %29 : vector<8x64xi1>, vector<8x64xf32>
    %cst_14 = arith.constant dense<0.000000e+00> : vector<8xf32>
    %31 = vector.multi_reduction <add>, %30, %cst_14 [1] : vector<8x64xf32> to vector<8xf32>
    %32 = vector.shape_cast %31 : vector<8xf32> to vector<8x1xf32>
    %cst_15 = arith.constant 3.125000e-02 : f32
    %33 = vector.broadcast %cst_15 : f32 to vector<8x1xf32>
    %34 = arith.mulf %32, %33 : vector<8x1xf32>
    %c0_16 = arith.constant 0 : index
    %c0_17 = arith.constant 0 : index
    %35 = vector.load %arg5[%c0_16, %c0_17] : memref<8x1xi32, #tpu.memory_space<vmem>>, vector<8x1xi32>
    %cst_18 = arith.constant 1.000000e+00 : f32
    %36 = vector.broadcast %cst_18 : f32 to vector<8x1xf32>
    %37 = arith.subf %36, %34 : vector<8x1xf32>
    %38 = arith.sitofp %35 : vector<8x1xi32> to vector<8x1xf32>
    %39 = arith.mulf %37, %38 : vector<8x1xf32>
    %c0_19 = arith.constant 0 : index
    %c0_20 = arith.constant 0 : index
    %40 = vector.load %arg4[%c0_19, %c0_20] : memref<8x2xf32, #tpu.memory_space<vmem>>, vector<8x2xf32>
    %cst_21 = arith.constant dense<0xFF800000> : vector<8xf32>
    %41 = vector.multi_reduction <maximumf>, %40, %cst_21 [1] : vector<8x2xf32> to vector<8xf32>
    %42 = vector.shape_cast %41 : vector<8xf32> to vector<8x1xf32>
    %43 = vector.broadcast %42 : vector<8x1xf32> to vector<8x2xf32>
    %44 = arith.subf %40, %43 : vector<8x2xf32>
    %45 = math.exp %44 : vector<8x2xf32>
    %cst_22 = arith.constant dense<0.000000e+00> : vector<8xf32>
    %46 = vector.multi_reduction <add>, %45, %cst_22 [1] : vector<8x2xf32> to vector<8xf32>
    %47 = vector.shape_cast %46 : vector<8xf32> to vector<8x1xf32>
    %48 = math.log %47 : vector<8x1xf32>
    %49 = arith.addf %42, %48 : vector<8x1xf32>
    %50 = tpu.iota {dimensions = array<i32: 1>} : vector<8x2xi32>
    %51 = vector.broadcast %35 : vector<8x1xi32> to vector<8x2xi32>
    %52 = arith.cmpi eq, %50, %51 : vector<8x2xi32>
    %cst_23 = arith.constant 0.000000e+00 : f32
    %53 = vector.broadcast %cst_23 : f32 to vector<8x2xf32>
    %54 = arith.select %52, %40, %53 : vector<8x2xi1>, vector<8x2xf32>
    %cst_24 = arith.constant dense<0.000000e+00> : vector<8xf32>
    %55 = vector.multi_reduction <add>, %54, %cst_24 [1] : vector<8x2xf32> to vector<8xf32>
    %56 = vector.shape_cast %55 : vector<8xf32> to vector<8x1xf32>
    %57 = arith.subf %49, %56 : vector<8x1xf32>
    %cst_25 = arith.constant 0.699999988 : f32
    %58 = vector.broadcast %cst_25 : f32 to vector<8x1xf32>
    %59 = arith.mulf %58, %57 : vector<8x1xf32>
    %cst_26 = arith.constant 3.000000e-01 : f32
    %60 = vector.broadcast %cst_26 : f32 to vector<8x1xf32>
    %61 = arith.mulf %60, %39 : vector<8x1xf32>
    %62 = arith.addf %59, %61 : vector<8x1xf32>
    %c0_27 = arith.constant 0 : index
    %c0_28 = arith.constant 0 : index
    %63 = vector.load %arg6[%c0_27, %c0_28] : memref<8x1xf32, #tpu.memory_space<vmem>>, vector<8x1xf32>
    tpu.vector_store %arg6[%c0_27, %c0_28], %62 {strides = array<i32>} : memref<8x1xf32, #tpu.memory_space<vmem>>, vector<8x1xf32>,
    return
  }
  func.func @transform_0(%arg0: i32) -> (i32, i32) {
    %c0_i32 = arith.constant 0 : i32
    %c0_i32_0 = arith.constant 0 : i32
    return %arg0, %c0_i32 : i32, i32
  }
  func.func @transform_1(%arg0: i32) -> (i32, i32) {
    %c0_i32 = arith.constant 0 : i32
    %c0_i32_0 = arith.constant 0 : i32
    %c0_i32_1 = arith.constant 0 : i32
    return %c0_i32, %c0_i32_0 : i32, i32
  }
  func.func @transform_2(%arg0: i32) -> (i32, i32) {
    %c0_i32 = arith.constant 0 : i32
    %c0_i32_0 = arith.constant 0 : i32
    return %arg0, %c0_i32 : i32, i32
  }
  func.func @transform_3(%arg0: i32) -> (i32, i32) {
    %c0_i32 = arith.constant 0 : i32
    %c0_i32_0 = arith.constant 0 : i32
    return %arg0, %c0_i32 : i32, i32
  }
  func.func @transform_4(%arg0: i32) -> (i32, i32) {
    %c0_i32 = arith.constant 0 : i32
    %c0_i32_0 = arith.constant 0 : i32
    return %arg0, %c0_i32 : i32, i32
  }
  func.func @transform_5(%arg0: i32) -> (i32, i32) {
    %c0_i32 = arith.constant 0 : i32
    %c0_i32_0 = arith.constant 0 : i32
    return %arg0, %c0_i32 : i32, i32
  }
}

</mosaic_0001>

<bundles_post_ra>
// kernel: tpu_custom_call.1
= control target key start
LH: loop header
LB: loop body
LE: loop exit
PB: predicated region body
PF: predicated region fallthrough
CT: control target
= control target key end

     0   :  { %10 = vsyncpa [#allocation3], 0  ;;  %s5640_s0 = inlined_call_operand.hbm [shape: bf16[1024,128], index: 0, kind: input, shape index: {}]   ;;  %s5641_s1 = inlined_call_operand.hbm [shape: bf16[128,128], index: 1, kind: input, shape index: {}]   ;;  %s5642_s2 = inlined_call_operand.hbm [shape: f32[1024,128], index: 2, kind: input, shape index: {}]   ;;  %s5643_s3 = inlined_call_operand.vmem [shape: f32[16,2], index: 3, kind: input, shape index: {}]   ;;  %s5644_s4 = inlined_call_operand.vmem [shape: s32[16,1], index: 4, kind: input, shape index: {}]   ;;  %s5645_s5 = inlined_call_operand.vmem [shape: f32[16,1], index: 5, kind: output, shape index: {}]  }
   0x1   :  { %12 = vsyncpa [#allocation3 + $0x1], 0 }
   0x2   :  { %13 = vsyncpa [#allocation5], 0  ;;  %s3796_s18 = smov 0   ;;  %s3798_s19 = smov 0  }
   0x3   :  { %s3800_s20 = smov 0   ;;  %s3802_s21 = smov 0  }
   0x4 LB: > { %s3817_s22 = sadd.s32 1, %s3755_s21   ;;  %s26_s23 = sadd.s32 1, %s3751_s20  ;;  %s3755_s21 = sphi %s3802_s21, %s6133_s21   ;;  %s3751_s20 = sphi %s3800_s20, %s6132_s20   ;;  %s3747_s19 = sphi %s3798_s19, %s6131_s19   ;;  %s3743_s18 = sphi %s3796_s18, %s6130_s18  }
   0x5   : > { %s23_s24 = ssub.s32 %s3755_s21, %s3817_s22  ;;  %p33_p0 = scmp.ne.s32.totalorder %s3751_s20, %s3747_s19 }
   0x6   : > { %p24_p1 = scmp.eq.s32.totalorder %s23_s24, 0  ;;  %p34_p2 = scmp.eq.s32.totalorder %s3755_s21, 0 }
   0x7   : > { %p3542_p4 = scmp.lt.s32.totalorder %s3755_s21, 2  ;;  %s201_s26 = sand.u32 1, %s3755_s21  }
   0x8   : > { %s3826_s25 = scalar_select %p24_p1, %s3751_s20, %s26_s23  }
   0x9   : > { %p35_p3 = por %p34_p2, %p33_p0  ;;  %s203_s27 = sand.u32 1, %s3751_s20  }
   0xa   : > { %s3329_s28 = sshll.u32 %s203_s27, 8  ;;  %s3384_s29 = sshll.u32 %s3755_s21, 12 }
   0xb   : > { %s3835_s7 = scalar_lea.hbm %s5640_s0, %s3384_s29  ;;  %s205_s8 = scalar_lea.vmem [#allocation2], %s3329_s28 }
   0xc   : > { %s212_s9 = sshll.u32 %s205_s8, 4  ;;  %p3837_p5 = pnand %p3542_p4, %p35_p3  ;;  %s3841_s9 = int_to_ptr.vmem [resolvable:$true] %s212_s9 }
   0xd   : > { %s3843_s11 = sshll.u32 %s203_s27, 9  ;;  %s3845_s12 = scalar_lea.sflag [#allocation3], %s201_s26 }
   0xe   : > { %s3631_s13 = scalar_lea.hbm %s3835_s7, 4096  ;;  %p5646_p7 = pneg %p3837_p5 }
   0xf   : > { %p3632_p6 = scmp.ne.s32.totalorder %s3835_s7, %s3631_s13  ;;  %s3636_s16 = scalar_lea.hbm %s5640_s0, 8192 }
  0x10   : > { %p3637_p10 = scmp.lt.s32.totalorder %s3835_s7, %s5640_s0  ;;  %p3638_p11 = scmp.lt.s32.totalorder %s3636_s16, %s3631_s13 }
  0x11   : > { %p3634_p8 = pnand %p5646_p7, %p3632_p6 }
  0x12   : > { %p3639_p12 = por %p3638_p11, %p3637_p10 }
  0x13   : > { %p3635_p9 = pneg %p3634_p8 }
  0x15   : > { %p3640_p13 = pnand %p3639_p12, %p3635_p9 }
  0x17   : > { %3643 = shalt.err (!%p3640_p13)
}
  0x18   : > { %s3644_s24 = scalar_lea.vmem %s3841_s9, 4096  ;;  %s3757_s26 = smov [#allocation2]  }
  0x19   : > { %p3645_p0 = scmp.ne.s32.totalorder %s3841_s9, %s3644_s24  ;;  %s3649_s27 = sshll.u32 %s3757_s26, 4  ;;  %s3650_s27 = int_to_ptr.vmem [resolvable:$false] %s3649_s27 }
  0x1a   : > { %s3651_s28 = scalar_lea.vmem %s3650_s27, 8192  ;;  %p3652_p3 = scmp.lt.s32.totalorder %s3841_s9, %s3650_s27 }
  0x1b   : > { %p3647_p1 = pnand %p3645_p0, %p5646_p7  ;;  %p3653_p4 = scmp.lt.s32.totalorder %s3651_s28, %s3644_s24 }
  0x1d   : > { %p3648_p2 = pneg %p3647_p1  ;;  %p3654_p6 = por %p3653_p4, %p3652_p3 }
  0x1f   : > { %p3655_p8 = pnand %p3654_p6, %p3648_p2 }
  0x21   : > { %3658 = shalt.err (!%p3655_p8)
}
  0x22   : > { %s3758_s29 = smov 64   ;;  %s3759_s30 = smov 4  }
  0x23   : > { %3537 = dma.hbm_to_vmem [thread:$0]  (!%p3837_p5), %s3835_s7, 4096, %s3841_s9, %s3845_s12, %s3758_s29, %s3758_s29, %s3759_s30  }
  0x24   : > { %s226_s6 = scalar_lea.vmem [#allocation6], %s3843_s11  ;;  %s3877_s13 = sadd.s32 4294967295, %s3755_s21  }
  0x25   : > { %s233_s8 = sshll.u32 %s226_s6, 4  ;;  %p39_p9 = scmp.ne.s32.totalorder %s3747_s19, %s3743_s18  ;;  %s3904_s8 = int_to_ptr.vmem [resolvable:$true] %s233_s8 }
  0x26   : > { %p5647_p10 = scmp.eq.s32.totalorder %s3877_s13, 0  ;;  %p3326_p11 = scmp.ge.s32.totalorder %s3755_s21, 1 }
  0x27   : > { %p175_p12 = scmp.lt.s32.totalorder %s3755_s21, 3  ;;  %s3760_s7 = smov [#allocation4]  }
  0x28   : > { %p3886_p13 = por %p5647_p10, %p39_p9  ;;  %s187_s9 = sshll.u32 %s3760_s7, 4  ;;  %s188_s9 = int_to_ptr.vmem [resolvable:$true] %s187_s9 }
  0x29   : > { %p3890_p0 = pnand %p3326_p11, %p175_p12  ;;  %s3385_s11 = sshll.u32 %s3755_s21, 13 }
  0x2a   : > { %s5784_s14 = scalar_select %p3886_p13, 1, 0 }
  0x2b   : > { %p3530_p1 = pneg %p3890_p0  ;;  %s3900_s17 = scalar_lea.hbm %s5642_s2, %s3385_s11 }
  0x2c   : > { %s3670_s23 = scalar_lea.vmem %s188_s9, 1024  ;;  %p3678_p9 = scmp.lt.s32.totalorder %s188_s9, %s188_s9 }
  0x2d   : > { %p3531_p2 = pnand %p3530_p1, %p5647_p10  ;;  %p3671_p4 = scmp.ne.s32.totalorder %s188_s9, %s3670_s23 }
  0x2e   : > { %p3679_p11 = scmp.lt.s32.totalorder %s3670_s23, %s3670_s23 }
  0x2f   : > { %p3661_p3 = pneg %p3531_p2 }
  0x30   : > { %p3680_p12 = por %p3679_p11, %p3678_p9 }
  0x31   : > { %p3673_p6 = pnand %p3671_p4, %p3661_p3 }
  0x33   : > { %p3674_p8 = pneg %p3673_p6 }
  0x35   : > { %p3681_p7 = pnand %p3680_p12, %p3674_p8 }
  0x37   : > { %3684 = shalt.err (!%p3681_p7)
}
  0x38   : > { %3533 = dma.hbm_to_vmem [thread:$0]  (!%p3531_p2), %s5641_s1, 1024, %s188_s9, [#allocation5], %s3758_s29, %s3758_s29, %s3759_s30  }
  0x39   : > { %s3685_s26 = scalar_lea.hbm %s3900_s17, 8192  ;;  %p5786_p3 = pneg %p3837_p5 }
  0x3a   : > { %p3686_p1 = scmp.ne.s32.totalorder %s3900_s17, %s3685_s26  ;;  %s3690_s6 = scalar_lea.hbm %s5642_s2, 16384 }
  0x3b   : > { %p3691_p7 = scmp.lt.s32.totalorder %s3900_s17, %s5642_s2  ;;  %p3692_p8 = scmp.lt.s32.totalorder %s3690_s6, %s3685_s26 }
  0x3c   : > { %p3688_p4 = pnand %p3686_p1, %p5786_p3 }
  0x3d   : > { %p3693_p9 = por %p3692_p8, %p3691_p7 }
  0x3e   : > { %p3689_p6 = pneg %p3688_p4 }
  0x40   : > { %p3694_p11 = pnand %p3693_p9, %p3689_p6 }
  0x42   : > { %3697 = shalt.err (!%p3694_p11)
}
  0x43   : > { %s3698_s29 = scalar_lea.vmem %s3904_s8, 8192  ;;  %p5787_p12 = pmov %p5786_p3 }
  0x44   : > { %p3699_p2 = scmp.ne.s32.totalorder %s3904_s8, %s3698_s29  ;;  %s3761_s30 = smov [#allocation6]  }
  0x45   : > { %s3703_s9 = sshll.u32 %s3761_s30, 4  ;;  %s3704_s9 = int_to_ptr.vmem [resolvable:$false] %s3703_s9 }
  0x46   : > { %p3701_p1 = pnand %p3699_p2, %p5787_p12  ;;  %s3705_s18 = scalar_lea.vmem %s3704_s9, 16384 }
  0x47   : > { %p3706_p4 = scmp.lt.s32.totalorder %s3904_s8, %s3704_s9  ;;  %p3707_p10 = scmp.lt.s32.totalorder %s3705_s18, %s3698_s29 }
  0x48   : > { %p3702_p3 = pneg %p3701_p1 }
  0x49   : > { %p3708_p13 = por %p3707_p10, %p3706_p4 }
  0x4b   : > { %p3709_p7 = pnand %p3708_p13, %p3702_p3 }
  0x4d   : > { %3712 = shalt.err (!%p3709_p7)
}
  0x4e   : > { %s3762_s16 = smov 128   ;;  %s3763_s23 = smov 8  }
  0x4f   : > { %3540 = dma.hbm_to_vmem [thread:$0]  (!%p3837_p5), %s3900_s17, 8192, %s3904_s8, %s3845_s12, %s3762_s16, %s3762_s16, %s3763_s23  }
  0x50   : > { %259 = sbr.rel (%p3890_p0) target bundleno = 1574 (0x626), region = 40 }
  0x55   : > { %s261_s21 = sand.u32 1, %s3877_s13   ;;  %s263_s24 = sand.u32 1, %s3747_s19  }
  0x56   : > { %s3336_s26 = sshll.u32 %s263_s24, 8  ;;  %s262_s27 = scalar_lea.sflag [#allocation3], %s261_s21 }
  0x57   : > { %s3939_s28 = scalar_lea.vmem [#allocation2], %s3336_s26  ;;  %p5788_p10 = scmp.ne.s32.totalorder %s5784_s14, 0 }
  0x59   : > { %3730 = dma.done.wait (%p5788_p10), %s262_s27, 4096  }
  0x5a   : > { %3732 = vsyncadd (%p5788_p10), %s262_s27, 4294963200  ;;  %p5789_p13 = scmp.eq.s32.totalorder %s3877_s13, 0 }
  0x5c   : > { %3734 = dma.done.wait (%p5789_p13), [#allocation5], 1024   ;;  %p5790_p5 = pmov %p5789_p13 }
  0x5d   : > { %s3338_s10 = sshll.u32 %s263_s24, 9 }
  0x5e   : > { %3736 = vsyncadd (%p5790_p5), [#allocation5], 4294966272  ;;  %s3949_s12 = scalar_lea.vmem [#allocation6], %s3338_s10 }
  0x5f   : > { %3738 = dma.done.wait (%p5788_p10), %s262_s27, 8192  }
  0x60   : > { %3740 = vsyncadd (%p5788_p10), %s262_s27, 4294959104  ;;  %v3585_v0 = vld [vmem:[#allocation4 + $0x38] sm:$0xff]   ;;  %v3586_v1 = vld [vmem:[#allocation4 + $0x30] sm:$0xff]   ;;  %vm1400_vm0 = vcmask 130112   ;;  %vm1407_vm1 = vcmask 195712   ;;  %vm1414_vm2 = vcmask 261312  }
  0x61   : > { %3426 = vmatprep.subr.bf16.mxu0 %v3585_v0  ;;  %3506 = vmatprep.subr.bf16.mxu1 %v3585_v0  ;;  %v3587_v2 = vld [vmem:[#allocation4 + $0x28] sm:$0xff]   ;;  %v3588_v3 = vld [vmem:[#allocation4 + $0x20] sm:$0xff]   ;;  %v3589_v6 = vld [vmem:[#allocation4 + $0x18] sm:$0xff]   ;;  %vm1421_vm3 = vcmask 326912   ;;  %vm1428_vm4 = vcmask 392512   ;;  %vm1435_vm5 = vcmask 458112  }
  0x62   : > { %3427 = vmatpush3.bf16.msra.mxu0 %v3585_v0  ;;  %3514 = vmatpush3.bf16.msra.mxu1 %v3585_v0  ;;  %v3593_v4 = vld [vmem:[%s3939_s28] sm:$0xff]   ;;  %v3590_v7 = vld [vmem:[#allocation4 + $0x10] sm:$0xff]   ;;  %v3591_v8 = vld [vmem:[#allocation4 + $0x8] sm:$0xff]   ;;  %vm1442_vm6 = vcmask 523712   ;;  %vm1717_vm7 = vcmask 1041409   ;;  %vm1719_vm8 = vcmask 1042434  }
  0x63   : > { %3428 = vmatprep.subr.bf16.mxu0 %v3586_v1  ;;  %3507 = vmatprep.subr.bf16.mxu1 %v3586_v1  ;;  %v3594_v5 = vld [vmem:[%s3939_s28 + $0x80] sm:$0xff]   ;;  %v3595_v10 = vld [vmem:[%s3939_s28 + $0x8] sm:$0xff]   ;;  %v3597_v12 = vld [vmem:[%s3939_s28 + $0x10] sm:$0xff]   ;;  %vm5782_vm9 = vcmask 1043459   ;;  %vm5781_vm10 = vcmask 1044484   ;;  %vm5780_vm11 = vcmask 1045509  }
  0x64   : > { %3442 = vmatprep.mubr.bf16.mxu0 %v3593_v4  ;;  %3474 = vmatprep.mubr.bf16.mxu1 %v3594_v5  ;;  %v3592_v9 = vld [vmem:[#allocation4] sm:$0xff]   ;;  %v3596_v11 = vld [vmem:[%s3939_s28 + $0x88] sm:$0xff]   ;;  %v3599_v13 = vld [vmem:[%s3939_s28 + $0x90] sm:$0xff]   ;;  %vm5779_vm12 = vcmask 1046534   ;;  %vm5778_vm13 = vcmask 1047559   ;;  %vm5777_vm14 = vcmask 523264  }
  0x65   : > { %v3598_v14 = vld [vmem:[%s3939_s28 + $0x18] sm:$0xff]   ;;  %v3601_v16 = vld [vmem:[%s3939_s28 + $0x20] sm:$0xff]   ;;  %v3602_v18 = vld [vmem:[%s3939_s28 + $0x28] sm:$0xff]   ;;  %p319_p0 = scmp.lt.s32.totalorder %s3877_s13, 1  ;;  %vm3179_vm15 = vcmask 15360  }
  0x66   : > { %3429 = vmatpush3.bf16.msra.mxu0 %v3586_v1  ;;  %3515 = vmatpush3.bf16.msra.mxu1 %v3586_v1  ;;  %v3600_v15 = vld [vmem:[%s3939_s28 + $0x98] sm:$0xff]   ;;  %v3603_v17 = vld [vmem:[%s3939_s28 + $0xa0] sm:$0xff]   ;;  %v3604_v19 = vld [vmem:[%s3939_s28 + $0xa8] sm:$0xff]  }
  0x67   : > { %3430 = vmatprep.subr.bf16.mxu0 %v3587_v2  ;;  %3508 = vmatprep.subr.bf16.mxu1 %v3587_v2  ;;  %v3605_v20 = vld [vmem:[%s3939_s28 + $0x30] sm:$0xff]   ;;  %v3606_v22 = vld [vmem:[%s3939_s28 + $0x38] sm:$0xff]   ;;  %v3609_v24 = vld [vmem:[%s3939_s28 + $0x40] sm:$0xff]   ;;  %s6135_s13 = smov (!%p319_p0, %s3877_s13), 1 }
  0x68   : > { %v3607_v21 = vld [vmem:[%s3939_s28 + $0xb0] sm:$0xff]   ;;  %v3608_v23 = vld [vmem:[%s3939_s28 + $0xb8] sm:$0xff]   ;;  %v3611_v25 = vld [vmem:[%s3939_s28 + $0xc0] sm:$0xff]   ;;  %s5192_s8 = sshll.u32 %s6135_s13, 3 }
  0x69   : > { %v3610_v26 = vld [vmem:[%s3939_s28 + $0x48] sm:$0xff]   ;;  %v3613_v28 = vld [vmem:[%s3939_s28 + $0x50] sm:$0xff]   ;;  %v3614_v30 = vld [vmem:[%s3939_s28 + $0x58] sm:$0xff]   ;;  %s322_s17 = scalar_lea.vmem %s5643_s3, %s5192_s8  ;;  %s326_s7 = scalar_lea.vmem %s5644_s4, %s5192_s8 }
  0x6a   : > { %3431 = vmatpush3.bf16.msra.mxu0 %v3587_v2  ;;  %3516 = vmatpush3.bf16.msra.mxu1 %v3587_v2  ;;  %v3612_v27 = vld [vmem:[%s3939_s28 + $0xc8] sm:$0xff]   ;;  %v3615_v29 = vld [vmem:[%s3939_s28 + $0xd0] sm:$0xff]   ;;  %v3616_v31 = vld [vmem:[%s3939_s28 + $0xd8] sm:$0xff]   ;;  %s330_s30 = scalar_lea.vmem %s5645_s5, %s5192_s8 }
  0x6b   : > { %3432 = vmatprep.subr.bf16.mxu0 %v3588_v3  ;;  %3509 = vmatprep.subr.bf16.mxu1 %v3588_v3  ;;  %v3617_v32 = vld [vmem:[%s3939_s28 + $0x60] sm:$0xff]   ;;  %v3618_v34 = vld [vmem:[%s3939_s28 + $0x68] sm:$0xff]   ;;  %v3621_v36 = vld [vmem:[%s3939_s28 + $0x70] sm:$0xff]  }
  0x6c   : > { %v3619_v33 = vld [vmem:[%s3939_s28 + $0xe0] sm:$0xff]   ;;  %v3620_v35 = vld [vmem:[%s3939_s28 + $0xe8] sm:$0xff]   ;;  %v3623_v37 = vld [vmem:[%s3939_s28 + $0xf0] sm:$0xff]  }
  0x6d   : > { %v3622_v38 = vld [vmem:[%s3939_s28 + $0x78] sm:$0xff]   ;;  %v1039_v42 = vld [vmem:[%s3949_s12 + $0x110] sm:$0xff]  ;;  %v1005_v53 = vld [vmem:[%s3949_s12] sm:$0xff] }
  0x6e   : > { %3433 = vmatpush3.bf16.msra.mxu0 %v3588_v3  ;;  %3517 = vmatpush3.bf16.msra.mxu1 %v3588_v3  ;;  %v3624_v39 = vld [vmem:[%s3939_s28 + $0xf8] sm:$0xff]   ;;  %v1007_v43 = vld [vmem:[%s3949_s12 + $0x10] sm:$0xff]  ;;  %v1037_v63 = vld [vmem:[%s3949_s12 + $0x100] sm:$0xff] }
  0x6f   : > { %3434 = vmatprep.subr.bf16.mxu0 %v3589_v6  ;;  %3510 = vmatprep.subr.bf16.mxu1 %v3589_v6  ;;  %v1008_v54 = vld [vmem:[%s3949_s12 + $0x18] sm:$0xff] }
  0x70   : > { %v1040_v0 = vld [vmem:[%s3949_s12 + $0x118] sm:$0xff] }
  0x72   : > { %3435 = vmatpush3.bf16.msra.mxu0 %v3589_v6  ;;  %3518 = vmatpush3.bf16.msra.mxu1 %v3589_v6 }
  0x73   : > { %3436 = vmatprep.subr.bf16.mxu0 %v3590_v7  ;;  %3511 = vmatprep.subr.bf16.mxu1 %v3590_v7 }
  0x76   : > { %3437 = vmatpush3.bf16.msra.mxu0 %v3590_v7  ;;  %3519 = vmatpush3.bf16.msra.mxu1 %v3590_v7 }
  0x77   : > { %3438 = vmatprep.subr.bf16.mxu0 %v3591_v8  ;;  %3512 = vmatprep.subr.bf16.mxu1 %v3591_v8 }
  0x7a   : > { %3439 = vmatpush3.bf16.msra.mxu0 %v3591_v8  ;;  %3520 = vmatpush3.bf16.msra.mxu1 %v3591_v8  ;;  %v1038_v8 = vld [vmem:[%s3949_s12 + $0x108] sm:$0xff] }
  0x7b   : > { %3440 = vmatprep.subr.bf16.mxu0 %v3592_v9  ;;  %3513 = vmatprep.subr.bf16.mxu1 %v3592_v9 }
  0x7e   : > { %3441 = vmatpush3.bf16.msra.mxu0 %v3592_v9  ;;  %3521 = vmatpush3.bf16.msra.mxu1 %v3592_v9  ;;  %v1006_v9 = vld [vmem:[%s3949_s12 + $0x8] sm:$0xff] }
  0x81   : > { %3443 = vmatmul.mubr.bf16.vlgmr.msra.gmra.mxu0 %v3595_v10  ;;  %3475 = vmatmul.mubr.bf16.vlgmr.msra.gmra.mxu1 %v3596_v11 }
  0x82   : > { %3446 = vmatprep.mubr.bf16.mxu0 %v3597_v12  ;;  %3478 = vmatprep.mubr.bf16.mxu1 %v3599_v13 }
  0x89   : > { %3447 = vmatmul.mubr.bf16.gmra.mxu0 %v3598_v14  ;;  %3479 = vmatmul.mubr.bf16.gmra.mxu1 %v3600_v15  ;;  %v1011_v15 = vld [vmem:[%s3949_s12 + $0x30] sm:$0xff] }
  0x8a   : > { %3450 = vmatprep.mubr.bf16.mxu0 %v3601_v16  ;;  %3482 = vmatprep.mubr.bf16.mxu1 %v3603_v17  ;;  %v1012_v16 = vld [vmem:[%s3949_s12 + $0x38] sm:$0xff] }
  0x91   : > { %3451 = vmatmul.mubr.bf16.gmra.mxu0 %v3602_v18  ;;  %3483 = vmatmul.mubr.bf16.gmra.mxu1 %v3604_v19 }
  0x92   : > { %3454 = vmatprep.mubr.bf16.mxu0 %v3605_v20  ;;  %3486 = vmatprep.mubr.bf16.mxu1 %v3607_v21 }
  0x99   : > { %3455 = vmatmul.mubr.bf16.gmra.mxu0 %v3606_v22  ;;  %3487 = vmatmul.mubr.bf16.gmra.mxu1 %v3608_v23  ;;  %v1043_v23 = vld [vmem:[%s3949_s12 + $0x130] sm:$0xff] }
  0x9a   : > { %3458 = vmatprep.mubr.bf16.mxu0 %v3609_v24  ;;  %3490 = vmatprep.mubr.bf16.mxu1 %v3611_v25  ;;  %v1044_v24 = vld [vmem:[%s3949_s12 + $0x138] sm:$0xff] }
  0xa1   : > { %3459 = vmatmul.mubr.bf16.gmra.mxu0 %v3610_v26  ;;  %3491 = vmatmul.mubr.bf16.gmra.mxu1 %v3612_v27 }
  0xa2   : > { %3462 = vmatprep.mubr.bf16.mxu0 %v3613_v28  ;;  %3494 = vmatprep.mubr.bf16.mxu1 %v3615_v29 }
  0xa9   : > { %3463 = vmatmul.mubr.bf16.gmra.mxu0 %v3614_v30  ;;  %3495 = vmatmul.mubr.bf16.gmra.mxu1 %v3616_v31  ;;  %v1009_v31 = vld [vmem:[%s3949_s12 + $0x20] sm:$0xff] }
  0xaa   : > { %3466 = vmatprep.mubr.bf16.mxu0 %v3617_v32  ;;  %3498 = vmatprep.mubr.bf16.mxu1 %v3619_v33  ;;  %v1010_v32 = vld [vmem:[%s3949_s12 + $0x28] sm:$0xff] }
  0xb1   : > { %3467 = vmatmul.mubr.bf16.gmra.mxu0 %v3618_v34  ;;  %3499 = vmatmul.mubr.bf16.gmra.mxu1 %v3620_v35 }
  0xb2   : > { %3470 = vmatprep.mubr.bf16.mxu0 %v3621_v36  ;;  %3502 = vmatprep.mubr.bf16.mxu1 %v3623_v37 }
  0xb9   : > { %3471 = vmatmul.mubr.bf16.gmra.mxu0 %v3622_v38  ;;  %3503 = vmatmul.mubr.bf16.gmra.mxu1 %v3624_v39  ;;  %v1041_v39 = vld [vmem:[%s3949_s12 + $0x120] sm:$0xff] }
 0x141   : > { %v3444_v40 = vpop.f32.mrf.mxu0  ;;  %v3476_v41 = vpop.f32.mrf.mxu1 }
 0x142   : > { %v943_v44 = vmax.f32 %v3444_v40, 0.0  ;;  %v975_v45 = vmax.f32 %v3476_v41, 0.0  ;;  %v1042_v40 = vld [vmem:[%s3949_s12 + $0x128] sm:$0xff] }
 0x143   : > { %v686_v46 = vpop.f32.mrf.mxu0  ;;  %v814_v47 = vpop.f32.mrf.mxu1 }
 0x144   : > { %v941_v48 = vmax.f32 %v686_v46, 0.0  ;;  %v1103_v49 = vmul.f32 %v1039_v42, %v975_v45  ;;  %v1071_v50 = vmul.f32 %v1007_v43, %v943_v44  ;;  %v973_v57 = vmax.f32 %v814_v47, 0.0  ;;  %v1015_v47 = vld [vmem:[%s3949_s12 + $0x50] sm:$0xff] }
 0x145   : > { %v3445_v51 = vpop.f32.mrf.mxu0  ;;  %v3477_v52 = vpop.f32.mrf.mxu1 }
 0x146   : > { %v944_v55 = vmax.f32 %v3445_v51, 0.0  ;;  %1201 = vadd.xlane.f32.xlu0 %v1103_v49  ;;  %1137 = vadd.xlane.f32.xlu1 %v1071_v50  ;;  %v976_v58 = vmax.f32 %v3477_v52, 0.0  ;;  %v1069_v59 = vmul.f32 %v1005_v53, %v941_v48  ;;  %v1101_v5 = vmul.f32 %v1037_v63, %v973_v57  ;;  %v1016_v48 = vld [vmem:[%s3949_s12 + $0x58] sm:$0xff]  ;;  %v1013_v63 = vld [vmem:[%s3949_s12 + $0x40] sm:$0xff] }
 0x147   : > { %v689_v56 = vpop.f32.mrf.mxu0  ;;  %v817_v61 = vpop.f32.mrf.mxu1 }
 0x148   : > { %v1072_v60 = vmul.f32 %v1008_v54, %v944_v55  ;;  %v942_v3 = vmax.f32 %v689_v56, 0.0  ;;  %v974_v4 = vmax.f32 %v817_v61, 0.0  ;;  %v1104_v6 = vmul.f32 %v1040_v0, %v976_v58  ;;  %v1047_v55 = vld [vmem:[%s3949_s12 + $0x150] sm:$0xff]  ;;  %v1048_v56 = vld [vmem:[%s3949_s12 + $0x158] sm:$0xff]  ;;  %v1014_v0 = vld [vmem:[%s3949_s12 + $0x48] sm:$0xff] }
 0x149   : > { %v3448_v62 = vpop.f32.mrf.mxu0  ;;  %v3480_v2 = vpop.f32.mrf.mxu1 }
 0x14a   : > { %1133 = vadd.xlane.f32.xlu0 %v1069_v59  ;;  %1139 = vadd.xlane.f32.xlu1 %v1072_v60  ;;  %v947_v11 = vmax.f32 %v3448_v62, 0.0  ;;  %v1102_v13 = vmul.f32 %v1038_v8, %v974_v4  ;;  %v1070_v14 = vmul.f32 %v1006_v9, %v942_v3  ;;  %v979_v18 = vmax.f32 %v3480_v2, 0.0  ;;  %v1046_v8 = vld [vmem:[%s3949_s12 + $0x148] sm:$0xff] }
 0x14b   : > { %v702_v1 = vpop.f32.mrf.mxu0  ;;  %v830_v10 = vpop.f32.mrf.mxu1 }
 0x14c   : > { %v1075_v20 = vmul.f32 %v1011_v15, %v947_v11  ;;  %v945_v26 = vmax.f32 %v702_v1, 0.0  ;;  %v1107_v28 = vmul.f32 %v1043_v23, %v979_v18  ;;  %v977_v35 = vmax.f32 %v830_v10, 0.0  ;;  %v1019_v15 = vld [vmem:[%s3949_s12 + $0x70] sm:$0xff] }
 0x14d   : > { %v3449_v7 = vpop.f32.mrf.mxu0  ;;  %v3481_v17 = vpop.f32.mrf.mxu1  ;;  %v1051_v23 = vld [vmem:[%s3949_s12 + $0x170] sm:$0xff] }
 0x14e   : > { %1197 = vadd.xlane.f32.xlu0 %v1101_v5  ;;  %1203 = vadd.xlane.f32.xlu1 %v1104_v6  ;;  %v948_v12 = vmax.f32 %v3449_v7, 0.0  ;;  %v980_v19 = vmax.f32 %v3481_v17, 0.0  ;;  %v1073_v37 = vmul.f32 %v1009_v31, %v945_v26  ;;  %v1105_v45 = vmul.f32 %v1041_v39, %v977_v35  ;;  %v1045_v7 = vld [vmem:[%s3949_s12 + $0x140] sm:$0xff] }
 0x14f   : > { %v705_v22 = vpop.f32.mrf.mxu0  ;;  %v833_v30 = vpop.f32.mrf.mxu1  ;;  %v1017_v31 = vld [vmem:[%s3949_s12 + $0x60] sm:$0xff] }
 0x150   : > { %v1076_v21 = vmul.f32 %v1012_v16, %v948_v12  ;;  %v946_v27 = vmax.f32 %v705_v22, 0.0  ;;  %v1108_v29 = vmul.f32 %v1044_v24, %v980_v19  ;;  %v978_v36 = vmax.f32 %v833_v30, 0.0  ;;  %v1020_v16 = vld [vmem:[%s3949_s12 + $0x78] sm:$0xff]  ;;  %v1049_v39 = vld [vmem:[%s3949_s12 + $0x160] sm:$0xff] }
 0x151   : > { %v3452_v25 = vpop.f32.mrf.mxu0  ;;  %v3484_v34 = vpop.f32.mrf.mxu1  ;;  %v1052_v24 = vld [vmem:[%s3949_s12 + $0x178] sm:$0xff] }
 0x152   : > { %1199 = vadd.xlane.f32.xlu1 %v1102_v13  ;;  %1135 = vadd.xlane.f32.xlu0 %v1070_v14  ;;  %v1074_v38 = vmul.f32 %v1010_v32, %v946_v27  ;;  %v951_v43 = vmax.f32 %v3452_v25, 0.0  ;;  %v1106_v46 = vmul.f32 %v1042_v40, %v978_v36  ;;  %v983_v50 = vmax.f32 %v3484_v34, 0.0  ;;  %v1018_v32 = vld [vmem:[%s3949_s12 + $0x68] sm:$0xff] }
 0x153   : > { %v718_v33 = vpop.f32.mrf.mxu0  ;;  %v846_v42 = vpop.f32.mrf.mxu1  ;;  %v1050_v40 = vld [vmem:[%s3949_s12 + $0x168] sm:$0xff] }
 0x154   : > { %v1079_v52 = vmul.f32 %v1015_v47, %v951_v43  ;;  %v949_v58 = vmax.f32 %v718_v33, 0.0  ;;  %v1111_v60 = vmul.f32 %v1047_v55, %v983_v50  ;;  %v981_v3 = vmax.f32 %v846_v42, 0.0  ;;  %v1023_v47 = vld [vmem:[%s3949_s12 + $0x90] sm:$0xff] }
 0x155   : > { %v3453_v41 = vpop.f32.mrf.mxu0  ;;  %v3485_v49 = vpop.f32.mrf.mxu1  ;;  %v1055_v55 = vld [vmem:[%s3949_s12 + $0x190] sm:$0xff] }
 0x156   : > { %1145 = vadd.xlane.f32.xlu0 %v1075_v20  ;;  %1147 = vadd.xlane.f32.xlu1 %v1076_v21  ;;  %v952_v44 = vmax.f32 %v3453_v41, 0.0  ;;  %v984_v51 = vmax.f32 %v3485_v49, 0.0  ;;  %v1077_v5 = vmul.f32 %v1013_v63, %v949_v58  ;;  %v1109_v13 = vmul.f32 %v1045_v7, %v981_v3  ;;  %v1021_v63 = vld [vmem:[%s3949_s12 + $0x80] sm:$0xff] }
 0x157   : > { %v721_v54 = vpop.f32.mrf.mxu0  ;;  %v849_v62 = vpop.f32.mrf.mxu1  ;;  %v1053_v7 = vld [vmem:[%s3949_s12 + $0x180] sm:$0xff] }
 0x158   : > { %v1080_v53 = vmul.f32 %v1016_v48, %v952_v44  ;;  %v950_v59 = vmax.f32 %v721_v54, 0.0  ;;  %v1112_v61 = vmul.f32 %v1048_v56, %v984_v51  ;;  %v982_v4 = vmax.f32 %v849_v62, 0.0  ;;  %v1024_v48 = vld [vmem:[%s3949_s12 + $0x98] sm:$0xff] }
 0x159   : > { %v3456_v57 = vpop.f32.mrf.mxu0  ;;  %v3488_v2 = vpop.f32.mrf.mxu1  ;;  %v1056_v56 = vld [vmem:[%s3949_s12 + $0x198] sm:$0xff] }
 0x15a   : > { %1209 = vadd.xlane.f32.xlu0 %v1107_v28  ;;  %1211 = vadd.xlane.f32.xlu1 %v1108_v29  ;;  %v1078_v6 = vmul.f32 %v1014_v0, %v950_v59  ;;  %v955_v11 = vmax.f32 %v3456_v57, 0.0  ;;  %v1110_v14 = vmul.f32 %v1046_v8, %v982_v4  ;;  %v987_v18 = vmax.f32 %v3488_v2, 0.0  ;;  %v1022_v0 = vld [vmem:[%s3949_s12 + $0x88] sm:$0xff] }
 0x15b   : > { %v734_v1 = vpop.f32.mrf.mxu0  ;;  %v862_v10 = vpop.f32.mrf.mxu1  ;;  %v1054_v8 = vld [vmem:[%s3949_s12 + $0x188] sm:$0xff] }
 0x15c   : > { %v1083_v20 = vmul.f32 %v1019_v15, %v955_v11  ;;  %v953_v26 = vmax.f32 %v734_v1, 0.0  ;;  %v1115_v28 = vmul.f32 %v1051_v23, %v987_v18  ;;  %v985_v35 = vmax.f32 %v862_v10, 0.0  ;;  %v1027_v15 = vld [vmem:[%s3949_s12 + $0xb0] sm:$0xff] }
 0x15d   : > { %v3457_v9 = vpop.f32.mrf.mxu0  ;;  %v3489_v17 = vpop.f32.mrf.mxu1  ;;  %v1059_v23 = vld [vmem:[%s3949_s12 + $0x1b0] sm:$0xff] }
 0x15e   : > { %1141 = vadd.xlane.f32.xlu0 %v1073_v37  ;;  %1143 = vadd.xlane.f32.xlu1 %v1074_v38  ;;  %v956_v12 = vmax.f32 %v3457_v9, 0.0  ;;  %v988_v19 = vmax.f32 %v3489_v17, 0.0  ;;  %v1081_v37 = vmul.f32 %v1017_v31, %v953_v26  ;;  %v1025_v31 = vld [vmem:[%s3949_s12 + $0xa0] sm:$0xff] }
 0x15f   : > { %v737_v22 = vpop.f32.mrf.mxu0  ;;  %v865_v30 = vpop.f32.mrf.mxu1 }
 0x160   : > { %v1084_v21 = vmul.f32 %v1020_v16, %v956_v12  ;;  %v954_v27 = vmax.f32 %v737_v22, 0.0  ;;  %v1116_v29 = vmul.f32 %v1052_v24, %v988_v19  ;;  %v986_v36 = vmax.f32 %v865_v30, 0.0  ;;  %v1028_v16 = vld [vmem:[%s3949_s12 + $0xb8] sm:$0xff] }
 0x161   : > { %v3460_v25 = vpop.f32.mrf.mxu0  ;;  %v3492_v34 = vpop.f32.mrf.mxu1  ;;  %v1060_v24 = vld [vmem:[%s3949_s12 + $0x1b8] sm:$0xff] }
 0x162   : > { %1205 = vadd.xlane.f32.xlu0 %v1105_v45  ;;  %1207 = vadd.xlane.f32.xlu1 %v1106_v46  ;;  %v1082_v38 = vmul.f32 %v1018_v32, %v954_v27  ;;  %v959_v43 = vmax.f32 %v3460_v25, 0.0  ;;  %v1113_v45 = vmul.f32 %v1049_v39, %v985_v35  ;;  %v1114_v46 = vmul.f32 %v1050_v40, %v986_v36  ;;  %v1026_v32 = vld [vmem:[%s3949_s12 + $0xa8] sm:$0xff]  ;;  %v1057_v39 = vld [vmem:[%s3949_s12 + $0x1a0] sm:$0xff] }
 0x163   : > { %v750_v33 = vpop.f32.mrf.mxu0  ;;  %v878_v42 = vpop.f32.mrf.mxu1  ;;  %v991_v50 = vmax.f32 %v3492_v34, 0.0  ;;  %v1058_v40 = vld [vmem:[%s3949_s12 + $0x1a8] sm:$0xff] }
 0x164   : > { %v957_v58 = vmax.f32 %v750_v33, 0.0  ;;  %v989_v3 = vmax.f32 %v878_v42, 0.0 }
 0x165   : > { %v3461_v41 = vpop.f32.mrf.mxu0  ;;  %v3493_v49 = vpop.f32.mrf.mxu1 }
 0x166   : > { %1153 = vadd.xlane.f32.xlu0 %v1079_v52  ;;  %1155 = vadd.xlane.f32.xlu1 %v1080_v53  ;;  %v960_v44 = vmax.f32 %v3461_v41, 0.0  ;;  %v992_v51 = vmax.f32 %v3493_v49, 0.0  ;;  %v1087_v52 = vmul.f32 %v1023_v47, %v959_v43  ;;  %v1031_v47 = vld [vmem:[%s3949_s12 + $0xd0] sm:$0xff] }
 0x167   : > { %v753_v54 = vpop.f32.mrf.mxu0  ;;  %v881_v62 = vpop.f32.mrf.mxu1 }
 0x168   : > { %v1088_v53 = vmul.f32 %v1024_v48, %v960_v44  ;;  %v958_v59 = vmax.f32 %v753_v54, 0.0  ;;  %v990_v4 = vmax.f32 %v881_v62, 0.0  ;;  %v1032_v48 = vld [vmem:[%s3949_s12 + $0xd8] sm:$0xff] }
 0x169   : > { %v3464_v57 = vpop.f32.mrf.mxu0  ;;  %v3496_v2 = vpop.f32.mrf.mxu1 }
 0x16a   : > { %1217 = vadd.xlane.f32.xlu0 %v1111_v60  ;;  %1219 = vadd.xlane.f32.xlu1 %v1112_v61  ;;  %v1119_v60 = vmul.f32 %v1055_v55, %v991_v50  ;;  %v1120_v61 = vmul.f32 %v1056_v56, %v992_v51  ;;  %v963_v11 = vmax.f32 %v3464_v57, 0.0  ;;  %v995_v18 = vmax.f32 %v3496_v2, 0.0  ;;  %v1063_v55 = vld [vmem:[%s3949_s12 + $0x1d0] sm:$0xff]  ;;  %v1064_v56 = vld [vmem:[%s3949_s12 + $0x1d8] sm:$0xff] }
 0x16b   : > { %v766_v1 = vpop.f32.mrf.mxu0  ;;  %v894_v10 = vpop.f32.mrf.mxu1 }
 0x16c   : > { %v961_v26 = vmax.f32 %v766_v1, 0.0  ;;  %v993_v35 = vmax.f32 %v894_v10, 0.0 }
 0x16d   : > { %v3465_v9 = vpop.f32.mrf.mxu0  ;;  %v3497_v17 = vpop.f32.mrf.mxu1 }
 0x16e   : > { %1149 = vadd.xlane.f32.xlu0 %v1077_v5  ;;  %1151 = vadd.xlane.f32.xlu1 %v1078_v6  ;;  %v1085_v5 = vmul.f32 %v1021_v63, %v957_v58  ;;  %v1086_v6 = vmul.f32 %v1022_v0, %v958_v59  ;;  %v964_v12 = vmax.f32 %v3465_v9, 0.0  ;;  %v996_v19 = vmax.f32 %v3497_v17, 0.0  ;;  %v1029_v63 = vld [vmem:[%s3949_s12 + $0xc0] sm:$0xff]  ;;  %v1030_v0 = vld [vmem:[%s3949_s12 + $0xc8] sm:$0xff] }
 0x16f   : > { %v769_v22 = vpop.f32.mrf.mxu0  ;;  %v897_v30 = vpop.f32.mrf.mxu1 }
 0x170   : > { %v962_v27 = vmax.f32 %v769_v22, 0.0  ;;  %v994_v36 = vmax.f32 %v897_v30, 0.0  ;;  %v1065_v30 = vld [vmem:[%s3949_s12 + $0x1e0] sm:$0xff] }
 0x171   : > { %v3468_v25 = vpop.f32.mrf.mxu0  ;;  %v3500_v34 = vpop.f32.mrf.mxu1 }
 0x172   : > { %1213 = vadd.xlane.f32.xlu0 %v1109_v13  ;;  %1215 = vadd.xlane.f32.xlu1 %v1110_v14  ;;  %v1117_v13 = vmul.f32 %v1053_v7, %v989_v3  ;;  %v1118_v14 = vmul.f32 %v1054_v8, %v990_v4  ;;  %v967_v43 = vmax.f32 %v3468_v25, 0.0  ;;  %v999_v50 = vmax.f32 %v3500_v34, 0.0  ;;  %v1061_v7 = vld [vmem:[%s3949_s12 + $0x1c0] sm:$0xff]  ;;  %v1062_v8 = vld [vmem:[%s3949_s12 + $0x1c8] sm:$0xff] }
 0x173   : > { %v782_v33 = vpop.f32.mrf.mxu0  ;;  %v910_v42 = vpop.f32.mrf.mxu1 }
 0x174   : > { %v965_v58 = vmax.f32 %v782_v33, 0.0  ;;  %v997_v3 = vmax.f32 %v910_v42, 0.0 }
 0x175   : > { %v3469_v41 = vpop.f32.mrf.mxu0  ;;  %v3501_v49 = vpop.f32.mrf.mxu1 }
 0x176   : > { %1161 = vadd.xlane.f32.xlu0 %v1083_v20  ;;  %1163 = vadd.xlane.f32.xlu1 %v1084_v21  ;;  %v1091_v20 = vmul.f32 %v1027_v15, %v963_v11  ;;  %v1092_v21 = vmul.f32 %v1028_v16, %v964_v12  ;;  %v968_v44 = vmax.f32 %v3469_v41, 0.0  ;;  %v1000_v51 = vmax.f32 %v3501_v49, 0.0  ;;  %v1035_v15 = vld [vmem:[%s3949_s12 + $0xf0] sm:$0xff]  ;;  %v1036_v16 = vld [vmem:[%s3949_s12 + $0xf8] sm:$0xff] }
 0x177   : > { %v785_v54 = vpop.f32.mrf.mxu0  ;;  %v913_v62 = vpop.f32.mrf.mxu1 }
 0x178   : > { %v966_v59 = vmax.f32 %v785_v54, 0.0  ;;  %v998_v4 = vmax.f32 %v913_v62, 0.0 }
 0x179   : > { %v3472_v57 = vpop.f32.mrf.mxu0  ;;  %v3504_v2 = vpop.f32.mrf.mxu1 }
 0x17a   : > { %1225 = vadd.xlane.f32.xlu0 %v1115_v28  ;;  %1227 = vadd.xlane.f32.xlu1 %v1116_v29  ;;  %v1123_v28 = vmul.f32 %v1059_v23, %v995_v18  ;;  %v1124_v29 = vmul.f32 %v1060_v24, %v996_v19  ;;  %v971_v11 = vmax.f32 %v3472_v57, 0.0  ;;  %v1033_v23 = vld [vmem:[%s3949_s12 + $0xe0] sm:$0xff]  ;;  %v1068_v24 = vld [vmem:[%s3949_s12 + $0x1f8] sm:$0xff] }
 0x17b   : > { %v798_v1 = vpop.f32.mrf.mxu0  ;;  %v926_v10 = vpop.f32.mrf.mxu1 }
 0x17c   : > { %v969_v18 = vmax.f32 %v798_v1, 0.0 }
 0x17d   : > { %v3473_v9 = vpop.f32.mrf.mxu0  ;;  %v3505_v17 = vpop.f32.mrf.mxu1 }
 0x17e   : > { %1157 = vadd.xlane.f32.xlu0 %v1081_v37  ;;  %1159 = vadd.xlane.f32.xlu1 %v1082_v38  ;;  %v1089_v37 = vmul.f32 %v1025_v31, %v961_v26  ;;  %v1090_v38 = vmul.f32 %v1026_v32, %v962_v27  ;;  %v972_v12 = vmax.f32 %v3473_v9, 0.0  ;;  %v1004_v19 = vmax.f32 %v3505_v17, 0.0  ;;  %v1034_v31 = vld [vmem:[%s3949_s12 + $0xe8] sm:$0xff] }
 0x17f   : > { %v801_v22 = vpop.f32.mrf.mxu0  ;;  %v1001_v26 = vmax.f32 %v926_v10, 0.0  ;;  %v1097_v27 = vmul.f32 %v1033_v23, %v969_v18  ;;  %v1003_v32 = vmax.f32 %v3504_v2, 0.0  ;;  %v1389_v10 = vlaneseq }
 0x180   : > { %v970_v25 = vmax.f32 %v801_v22, 0.0 }
 0x181   : > { %v1129_v34 = vmul.f32 %v1065_v30, %v1001_v26  ;;  %v4130_v17 = vshrl.u32 %v1389_v10, 7 }
 0x182   : > { %1221 = vadd.xlane.f32.xlu0 %v1113_v45  ;;  %1223 = vadd.xlane.f32.xlu1 %v1114_v46  ;;  %v1121_v45 = vmul.f32 %v1057_v39, %v993_v35  ;;  %v1122_v46 = vmul.f32 %v1058_v40, %v994_v36  ;;  %v1098_v35 = vmul.f32 %v1034_v31, %v970_v25  ;;  %v1067_v36 = vld [vmem:[%s3949_s12 + $0x1f0] sm:$0xff] }
 0x183   : > { %5816 = vst [vmem:[#allocation35_spill] sm:$0xff] %v4130_v17 }
 0x186   : > { %1169 = vadd.xlane.f32.xlu0 %v1087_v52  ;;  %1171 = vadd.xlane.f32.xlu1 %v1088_v53  ;;  %v1095_v52 = vmul.f32 %v1031_v47, %v967_v43  ;;  %v1096_v53 = vmul.f32 %v1032_v48, %v968_v44 }
 0x18a   : > { %1233 = vadd.xlane.f32.xlu0 %v1119_v60  ;;  %1235 = vadd.xlane.f32.xlu1 %v1120_v61  ;;  %v1127_v60 = vmul.f32 %v1063_v55, %v999_v50  ;;  %v1128_v61 = vmul.f32 %v1064_v56, %v1000_v51 }
 0x18e   : > { %1165 = vadd.xlane.f32.xlu0 %v1085_v5  ;;  %1167 = vadd.xlane.f32.xlu1 %v1086_v6  ;;  %v1093_v5 = vmul.f32 %v1029_v63, %v965_v58  ;;  %v1094_v6 = vmul.f32 %v1030_v0, %v966_v59 }
 0x192   : > { %1229 = vadd.xlane.f32.xlu0 %v1117_v13  ;;  %1231 = vadd.xlane.f32.xlu1 %v1118_v14  ;;  %v1125_v13 = vmul.f32 %v1061_v7, %v997_v3  ;;  %v1126_v14 = vmul.f32 %v1062_v8, %v998_v4 }
 0x196   : > { %1177 = vadd.xlane.f32.xlu0 %v1091_v20  ;;  %1179 = vadd.xlane.f32.xlu1 %v1092_v21  ;;  %v1099_v20 = vmul.f32 %v1035_v15, %v971_v11  ;;  %v1100_v21 = vmul.f32 %v1036_v16, %v972_v12 }
 0x19a   : > { %1241 = vadd.xlane.f32.xlu0 %v1123_v28  ;;  %1243 = vadd.xlane.f32.xlu1 %v1124_v29  ;;  %v1132_v28 = vmul.f32 %v1068_v24, %v1004_v19  ;;  %v929_v29 = vpop.f32.mrf.mxu1 }
 0x19b   : > { %v1002_v33 = vmax.f32 %v929_v29, 0.0 }
 0x19e   : > { %1173 = vadd.xlane.f32.xlu0 %v1089_v37  ;;  %1175 = vadd.xlane.f32.xlu1 %v1090_v38  ;;  %v1066_v37 = vld [vmem:[%s3949_s12 + $0x1e8] sm:$0xff]  ;;  %v1131_v38 = vmul.f32 %v1067_v36, %v1003_v32 }
 0x19f   : > { %v1130_v39 = vmul.f32 %v1066_v37, %v1002_v33 }
 0x1a2   : > { %1237 = vadd.xlane.f32.xlu0 %v1121_v45  ;;  %1239 = vadd.xlane.f32.xlu1 %v1122_v46 }
 0x1a6   : > { %1185 = vadd.xlane.f32.xlu0 %v1095_v52  ;;  %1187 = vadd.xlane.f32.xlu1 %v1096_v53 }
 0x1aa   : > { %1249 = vadd.xlane.f32.xlu0 %v1127_v60  ;;  %1251 = vadd.xlane.f32.xlu1 %v1128_v61 }
 0x1ae   : > { %1181 = vadd.xlane.f32.xlu0 %v1093_v5  ;;  %1183 = vadd.xlane.f32.xlu1 %v1094_v6 }
 0x1b2   : > { %1245 = vadd.xlane.f32.xlu0 %v1125_v13  ;;  %1247 = vadd.xlane.f32.xlu1 %v1126_v14  ;;  %v4123_v13 = vand.u32 127, %v1389_v10 }
 0x1b4   : > { %5815 = vst [vmem:[#allocation34_spill] sm:$0xff] %v4123_v13  ;;  %v1395_v14 = vadd.s32 4294967288, %v4123_v13  ;;  %v1402_v18 = vadd.s32 4294967280, %v4123_v13  ;;  %v1409_v23 = vadd.s32 4294967272, %v4123_v13  ;;  %v4144_v24 = vsub.s32 %v4123_v13, %v4130_v17 }
 0x1b5   : > { %v1437_v10 = vadd.s32 4294967240, %v4123_v13 }
 0x1b6   : > { %1193 = vadd.xlane.f32.xlu0 %v1099_v20  ;;  %1195 = vadd.xlane.f32.xlu1 %v1100_v21  ;;  %v4134_v19 = vsub.s32 %v1395_v14, %v4130_v17  ;;  %5820 = vst [vmem:[#allocation39_spill] sm:$0xff] %v4144_v24 }
 0x1b8   : > { %5817 = vst [vmem:[#allocation36_spill] sm:$0xff] %v4134_v19 }
 0x1ba   : > { %1189 = vadd.xlane.f32.xlu0 %v1097_v27  ;;  %1259 = vadd.xlane.f32.xlu1 %v1132_v28  ;;  %v1416_v27 = vadd.s32 4294967264, %v4123_v13  ;;  %v4150_v28 = vsub.s32 %v1402_v18, %v4130_v17 }
 0x1bc   : > { %5821 = vst [vmem:[#allocation40_spill] sm:$0xff] %v4150_v28  ;;  %v4175_v14 = vsub.s32 %v1416_v27, %v4130_v17 }
 0x1be   : > { %1253 = vadd.xlane.f32.xlu0 %v1129_v34  ;;  %1191 = vadd.xlane.f32.xlu1 %v1098_v35  ;;  %v4162_v34 = vsub.s32 %v1409_v23, %v4130_v17  ;;  %v1430_v35 = vadd.s32 4294967248, %v4123_v13  ;;  %5822 = vst [vmem:[#allocation41_spill] sm:$0xff] %v4175_v14 }
 0x1c0   : > { %v4192_v18 = vsub.s32 %v1430_v35, %v4130_v17 }
 0x1c2   : > { %1257 = vadd.xlane.f32.xlu0 %v1131_v38  ;;  %1255 = vadd.xlane.f32.xlu1 %v1130_v39  ;;  %v1423_v38 = vadd.s32 4294967256, %v4123_v13 }
 0x1cf   : > { %v4051_v40 = vpop.xlane.xlu0 %1201  ;;  %v4053_v41 = vpop.xlane.xlu1 %1137 }
 0x1d0   : > { %5791 = vst [vmem:[#allocation10_spill] sm:$0xff] %v4051_v40  ;;  %5792 = vst [vmem:[#allocation11_spill] sm:$0xff] %v4053_v41  ;;  %v5823_v27 = vmax.f32 %v4053_v41, 0.0 }
 0x1d2   : > { %v1406_v13 = vrot.slane %v5823_v27, %v4150_v28 }
 0x1d3   : > { %v4055_v42 = vpop.xlane.xlu0 %1133  ;;  %v4057_v43 = vpop.xlane.xlu1 %1139 }
 0x1d4   : > { %5793 = vst [vmem:[#allocation12_spill] sm:$0xff] %v4057_v43  ;;  %v5649_v25 = vmax.f32 %v4055_v42, 0.0 }
 0x1d6   : > { %v1394_v36 = vrot.slane %v5649_v25, %v4144_v24 }
 0x1d7   : > { %v4059_v44 = vpop.xlane.xlu0 %1197  ;;  %v4061_v45 = vpop.xlane.xlu1 %1203 }
 0x1d8   : > { %5794 = vst [vmem:[#allocation13_spill] sm:$0xff] %v4059_v44  ;;  %5795 = vst [vmem:[#allocation14_spill] sm:$0xff] %v4061_v45  ;;  %v5655_v29 = vmax.f32 %v4059_v44, 0.0 }
 0x1da   : > { %v1564_v25 = vrot.slane %v5655_v29, %v4144_v24 }
 0x1db   : > { %v4063_v46 = vpop.xlane.xlu1 %1199  ;;  %v4065_v47 = vpop.xlane.xlu0 %1135 }
 0x1dc   : > { %5796 = vst [vmem:[#allocation15_spill] sm:$0xff] %v4063_v46  ;;  %v5650_v20 = vmax.f32 %v4065_v47, 0.0  ;;  %v5651_v26 = vmax.f32 %v4063_v46, 0.0 }
 0x1de   : > { %v1399_v30 = vrot.slane %v5650_v20, %v4134_v19  ;;  %v1568_v37 = vrot.slane %v5651_v26, %v4134_v19  ;;  %v5824_v20 = vmax.f32 %v4051_v40, 0.0 }
 0x1df   : > { %v4067_v48 = vpop.xlane.xlu0 %1145  ;;  %v4069_v49 = vpop.xlane.xlu1 %1147 }
 0x1e0   : > { %5797 = vst [vmem:[#allocation16_spill] sm:$0xff] %v4069_v49  ;;  %v1401_v26 = vsel %vm1400_vm0, %v1399_v30, %v1394_v36  ;;  %v1569_v29 = vsel %vm1400_vm0, %v1568_v37, %v1564_v25  ;;  %v4198_v30 = vsub.s32 %v1423_v38, %v4130_v17  ;;  %v1573_v44 = vrot.slane %v5824_v20, %v4150_v28 }
 0x1e1   : > { %v1408_v27 = vsel %vm1407_vm1, %v1406_v13, %v1401_v26  ;;  %v5826_v25 = vmax.f32 %v4057_v43, 0.0  ;;  %v5827_v38 = vmax.f32 %v4061_v45, 0.0 }
 0x1e2   : > { %v1574_v13 = vsel %vm1407_vm1, %v1573_v44, %v1569_v29 }
 0x1e3   : > { %v4071_v50 = vpop.xlane.xlu0 %1209  ;;  %v4073_v51 = vpop.xlane.xlu1 %1211  ;;  %v1413_v37 = vrot.slane %v5826_v25, %v4162_v34  ;;  %v1578_v36 = vrot.slane %v5827_v38, %v4162_v34 }
 0x1e4   : > { %5798 = vst [vmem:[#allocation17_spill] sm:$0xff] %v4071_v50  ;;  %5799 = vst [vmem:[#allocation18_spill] sm:$0xff] %v4073_v51 }
 0x1e5   : > { %v1415_v38 = vsel %vm1414_vm2, %v1413_v37, %v1408_v27  ;;  %v4240_v27 = vsub.s32 %v1437_v10, %v4130_v17 }
 0x1e7   : > { %v4075_v52 = vpop.xlane.xlu0 %1141  ;;  %v4077_v53 = vpop.xlane.xlu1 %1143 }
 0x1e8   : > { %5800 = vst [vmem:[#allocation19_spill] sm:$0xff] %v4075_v52  ;;  %5801 = vst [vmem:[#allocation20_spill] sm:$0xff] %v4077_v53  ;;  %v5825_v35 = vmax.f32 %v4075_v52, 0.0  ;;  %v5831_v45 = vmax.f32 %v4077_v53, 0.0 }
 0x1ea   : > { %v1420_v23 = vrot.slane %v5825_v35, %v4175_v14  ;;  %v1427_v43 = vrot.slane %v5831_v45, %v4198_v30 }
 0x1eb   : > { %v4079_v54 = vpop.xlane.xlu0 %1205  ;;  %v4081_v55 = vpop.xlane.xlu1 %1207 }
 0x1ec   : > { %5802 = vst [vmem:[#allocation21_spill] sm:$0xff] %v4079_v54  ;;  %5803 = vst [vmem:[#allocation22_spill] sm:$0xff] %v4081_v55  ;;  %v1422_v29 = vsel %vm1421_vm3, %v1420_v23, %v1415_v38  ;;  %v5832_v26 = vmax.f32 %v4079_v54, 0.0  ;;  %v5834_v23 = vmax.f32 %v4067_v48, 0.0  ;;  %v1579_v38 = vsel %vm1414_vm2, %v1578_v36, %v1574_v13 }
 0x1ed   : > { %v1429_v37 = vsel %vm1428_vm4, %v1427_v43, %v1422_v29  ;;  %v5835_v45 = vmax.f32 %v4081_v55, 0.0 }
 0x1ef   : > { %v4083_v56 = vpop.xlane.xlu0 %1153  ;;  %v4085_v57 = vpop.xlane.xlu1 %1155  ;;  %v1588_v54 = vrot.slane %v5835_v45, %v4198_v30 }
 0x1f0   : > { %5804 = vst [vmem:[#allocation23_spill] sm:$0xff] %v4085_v57 }
 0x1f3   : > { %v4087_v58 = vpop.xlane.xlu0 %1217  ;;  %v4089_v59 = vpop.xlane.xlu1 %1219 }
 0x1f4   : > { %5805 = vst [vmem:[#allocation24_spill] sm:$0xff] %v4087_v58  ;;  %5806 = vst [vmem:[#allocation25_spill] sm:$0xff] %v4089_v59 }
 0x1f7   : > { %v4091_v60 = vpop.xlane.xlu0 %1149  ;;  %v4093_v61 = vpop.xlane.xlu1 %1151 }
 0x1f8   : > { %5807 = vst [vmem:[#allocation26_spill] sm:$0xff] %v4091_v60  ;;  %5808 = vst [vmem:[#allocation27_spill] sm:$0xff] %v4093_v61  ;;  %v5829_v35 = vmax.f32 %v4091_v60, 0.0  ;;  %v5830_v25 = vmax.f32 %v4093_v61, 0.0  ;;  %v5836_v61 = vmax.f32 %v4083_v56, 0.0 }
 0x1fa   : > { %v1447_v46 = vrot.slane %v5829_v35, %v4144_v24  ;;  %v1451_v52 = vrot.slane %v5830_v25, %v4134_v19  ;;  %v1583_v35 = vrot.slane %v5832_v26, %v4175_v14  ;;  %v1434_v26 = vrot.slane %v5834_v23, %v4192_v18 }
 0x1fb   : > { %v4095_v62 = vpop.xlane.xlu0 %1213  ;;  %v4097_v63 = vpop.xlane.xlu1 %1215  ;;  %v1456_v53 = vrot.slane %v5836_v61, %v4150_v28 }
 0x1fc   : > { %5809 = vst [vmem:[#allocation28_spill] sm:$0xff] %v4095_v62  ;;  %5810 = vst [vmem:[#allocation29_spill] sm:$0xff] %v4097_v63  ;;  %v1452_v10 = vsel %vm1400_vm0, %v1451_v52, %v1447_v46  ;;  %v1584_v23 = vsel %vm1421_vm3, %v1583_v35, %v1579_v38  ;;  %v5837_v36 = vmax.f32 %v4095_v62, 0.0  ;;  %v5838_v46 = vmax.f32 %v4097_v63, 0.0 }
 0x1fd   : > { %v1457_v29 = vsel %vm1407_vm1, %v1456_v53, %v1452_v10  ;;  %v5841_v10 = vmax.f32 %v4069_v49, 0.0  ;;  %v5842_v35 = vmax.f32 %v4071_v50, 0.0  ;;  %v1436_v63 = vsel %vm1435_vm5, %v1434_v26, %v1429_v37 }
 0x1fe   : > { %v1603_v13 = vrot.slane %v5837_v36, %v4144_v24  ;;  %v1607_v52 = vrot.slane %v5838_v46, %v4134_v19  ;;  %v5840_v46 = vmax.f32 %v4085_v57, 0.0  ;;  %v1589_v55 = vsel %vm1428_vm4, %v1588_v54, %v1584_v23 }
 0x1ff   : > { %v4099_v0 = vpop.xlane.xlu0 %1161  ;;  %v4101_v1 = vpop.xlane.xlu1 %1163  ;;  %v1593_v61 = vrot.slane %v5842_v35, %v4192_v18 }
 0x200   : > { %v1461_v43 = vrot.slane %v5840_v46, %v4162_v34  ;;  %v1608_v62 = vsel %vm1400_vm0, %v1607_v52, %v1603_v13  ;;  %v5846_v52 = vmax.f32 %v4073_v51, 0.0 }
 0x202   : > { %v1462_v46 = vsel %vm1414_vm2, %v1461_v43, %v1457_v29  ;;  %v4314_v43 = vrot.slane %v5846_v52, %v4240_v27 }
 0x203   : > { %v4103_v2 = vpop.xlane.xlu0 %1225  ;;  %v4105_v3 = vpop.xlane.xlu1 %1227 }
 0x204   : > { %5811 = vst [vmem:[#allocation30_spill] sm:$0xff] %v4103_v2  ;;  %5812 = vst [vmem:[#allocation31_spill] sm:$0xff] %v4105_v3 }
 0x207   : > { %v4107_v4 = vpop.xlane.xlu0 %1157  ;;  %v4109_v5 = vpop.xlane.xlu1 %1159 }
 0x208   : > { %v5839_v45 = vmax.f32 %v4107_v4, 0.0  ;;  %v5843_v53 = vmax.f32 %v4109_v5, 0.0 }
 0x20a   : > { %v1466_v60 = vrot.slane %v5839_v45, %v4175_v14  ;;  %v1441_v45 = vrot.slane %v5841_v10, %v4240_v27  ;;  %v1471_v57 = vrot.slane %v5843_v53, %v4198_v30 }
 0x20b   : > { %v4111_v6 = vpop.xlane.xlu0 %1221  ;;  %v4113_v7 = vpop.xlane.xlu1 %1223 }
 0x20c   : > { %5813 = vst [vmem:[#allocation32_spill] sm:$0xff] %v4111_v6  ;;  %5814 = vst [vmem:[#allocation33_spill] sm:$0xff] %v4113_v7  ;;  %v1467_v49 = vsel %vm1421_vm3, %v1466_v60, %v1462_v46  ;;  %v5847_v60 = vmax.f32 %v4087_v58, 0.0  ;;  %v1443_v46 = vsel %vm1442_vm6, %v1441_v45, %v1436_v63  ;;  %v5851_v45 = vmax.f32 %v4111_v6, 0.0 }
 0x20d   : > { %v1472_v52 = vsel %vm1428_vm4, %v1471_v57, %v1467_v49 }
 0x20e   : > { %v1612_v29 = vrot.slane %v5847_v60, %v4150_v28  ;;  %v5848_v60 = vmax.f32 %v4089_v59, 0.0  ;;  %v1622_v57 = vrot.slane %v5851_v45, %v4175_v14 }
 0x20f   : > { %v4115_v8 = vpop.xlane.xlu0 %1169  ;;  %v4117_v9 = vpop.xlane.xlu1 %1171 }
 0x210   : > { %v5673_v53 = vmax.f32 %v4115_v8, 0.0  ;;  %v1613_v36 = vsel %vm1407_vm1, %v1612_v29, %v1608_v62  ;;  %v1617_v63 = vrot.slane %v5848_v60, %v4162_v34 }
 0x212   : > { %v1495_v60 = vrot.slane %v5673_v53, %v4150_v28 }
 0x213   : > { %v4119_v11 = vpop.xlane.xlu0 %1233  ;;  %v4121_v12 = vpop.xlane.xlu1 %1235 }
 0x217   : > { %v4126_v15 = vpop.xlane.xlu0 %1165  ;;  %v4128_v16 = vpop.xlane.xlu1 %1167 }
 0x218   : > { %v5844_v35 = vmax.f32 %v4126_v15, 0.0  ;;  %v5845_v54 = vmax.f32 %v4128_v16, 0.0 }
 0x21a   : > { %v1486_v37 = vrot.slane %v5844_v35, %v4144_v24  ;;  %v1490_v26 = vrot.slane %v5845_v54, %v4134_v19  ;;  %v4322_v35 = vsel %vm1435_vm5, %v1593_v61, %v1589_v55  ;;  %v5675_v54 = vmax.f32 %v4101_v1, 0.0 }
 0x21b   : > { %v4137_v21 = vpop.xlane.xlu0 %1229  ;;  %v4139_v22 = vpop.xlane.xlu1 %1231  ;;  %v5849_v55 = vmax.f32 %v4099_v0, 0.0 }
 0x21c   : > { %5818 = vst [vmem:[#allocation37_spill] sm:$0xff] %v4137_v21  ;;  %5819 = vst [vmem:[#allocation38_spill] sm:$0xff] %v4139_v22  ;;  %v5676_v51 = vmax.f32 %v4137_v21, 0.0  ;;  %v1491_v10 = vsel %vm1400_vm0, %v1490_v26, %v1486_v37  ;;  %v1618_v26 = vsel %vm1414_vm2, %v1617_v63, %v1613_v36  ;;  %v5852_v58 = vmax.f32 %v4139_v22, 0.0 }
 0x21d   : > { %v1476_v61 = vrot.slane %v5849_v55, %v4192_v18  ;;  %v1481_v55 = vrot.slane %v5675_v54, %v4240_v27  ;;  %v1496_v29 = vsel %vm1407_vm1, %v1495_v60, %v1491_v10  ;;  %v5853_v36 = vmax.f32 %v4117_v9, 0.0 }
 0x21e   : > { %v1642_v53 = vrot.slane %v5676_v51, %v4144_v24  ;;  %v1646_v59 = vrot.slane %v5852_v58, %v4134_v19  ;;  %v5855_v51 = vmax.f32 %v4103_v2, 0.0  ;;  %v1623_v21 = vsel %vm1421_vm3, %v1622_v57, %v1618_v26 }
 0x21f   : > { %v4156_v31 = vpop.xlane.xlu0 %1177  ;;  %v4158_v32 = vpop.xlane.xlu1 %1179  ;;  %v1477_v37 = vsel %vm1435_vm5, %v1476_v61, %v1472_v52  ;;  %v1500_v63 = vrot.slane %v5853_v36, %v4162_v34  ;;  %v5856_v52 = vmax.f32 %v4113_v7, 0.0 }
 0x220   : > { %v4377_v58 = vrot.slane %v5855_v51, %v4192_v18  ;;  %v1482_v10 = vsel %vm1442_vm6, %v1481_v55, %v1477_v37  ;;  %v1647_v51 = vsel %vm1400_vm0, %v1646_v59, %v1642_v53  ;;  %v5691_v59 = vmax.f32 %v4158_v32, 0.0 }
 0x221   : > { %v1627_v54 = vrot.slane %v5856_v52, %v4198_v30  ;;  %v1501_v2 = vsel %vm1414_vm2, %v1500_v63, %v1496_v29  ;;  %v5861_v63 = vmax.f32 %v4105_v3, 0.0 }
 0x223   : > { %v4184_v33 = vpop.xlane.xlu0 %1241  ;;  %v4186_v39 = vpop.xlane.xlu1 %1243  ;;  %v1628_v29 = vsel %vm1428_vm4, %v1627_v54, %v1623_v21 }
 0x227   : > { %v4215_v40 = vpop.xlane.xlu0 %1173  ;;  %v4217_v20 = vpop.xlane.xlu1 %1175 }
 0x228   : > { %5828 = vst [vmem:[#allocation42_spill] sm:$0xff] %v4217_v20  ;;  %v5857_v36 = vmax.f32 %v4215_v40, 0.0  ;;  %v5858_v52 = vmax.f32 %v4217_v20, 0.0 }
 0x22a   : > { %v1505_v61 = vrot.slane %v5857_v36, %v4175_v14  ;;  %v1510_v22 = vrot.slane %v5858_v52, %v4198_v30  ;;  %v4411_v52 = vrot.slane %v5861_v63, %v4240_v27  ;;  %v5863_v63 = vmax.f32 %v4121_v12, 0.0 }
 0x22b   : > { %v4244_v41 = vpop.xlane.xlu0 %1237  ;;  %v4246_v44 = vpop.xlane.xlu1 %1239 }
 0x22c   : > { %5833 = vst [vmem:[#allocation43_spill] sm:$0xff] %v4246_v44  ;;  %v1506_v50 = vsel %vm1421_vm3, %v1505_v61, %v1501_v2  ;;  %v1656_v3 = vrot.slane %v5863_v63, %v4162_v34  ;;  %v5865_v61 = vmax.f32 %v4244_v41, 0.0 }
 0x22d   : > { %v1511_v54 = vsel %vm1428_vm4, %v1510_v22, %v1506_v50 }
 0x22e   : > { %v1661_v21 = vrot.slane %v5865_v61, %v4175_v14 }
 0x22f   : > { %v4276_v38 = vpop.xlane.xlu0 %1185  ;;  %v4278_v25 = vpop.xlane.xlu1 %1187 }
 0x233   : > { %v4307_v23 = vpop.xlane.xlu0 %1249  ;;  %v4309_v13 = vpop.xlane.xlu1 %1251 }
 0x237   : > { %v4338_v62 = vpop.xlane.xlu0 %1181  ;;  %v4340_v49 = vpop.xlane.xlu1 %1183 }
 0x238   : > { %5850 = vst [vmem:[#allocation44_spill] sm:$0xff] %v4340_v49  ;;  %v5859_v36 = vmax.f32 %v4338_v62, 0.0  ;;  %v5860_v57 = vmax.f32 %v4340_v49, 0.0  ;;  %v1718_v49 = vsel %vm1717_vm7, %v1482_v10, %v1443_v46 }
 0x23a   : > { %v1525_v55 = vrot.slane %v5859_v36, %v4144_v24  ;;  %v1529_v37 = vrot.slane %v5860_v57, %v4134_v19  ;;  %v5862_v36 = vmax.f32 %v4119_v11, 0.0  ;;  %v5690_v57 = vmax.f32 %v4276_v38, 0.0 }
 0x23b   : > { %v4370_v45 = vpop.xlane.xlu0 %1245  ;;  %v4372_v60 = vpop.xlane.xlu1 %1247 }
 0x23c   : > { %5854 = vst [vmem:[#allocation45_spill] sm:$0xff] %v4372_v60  ;;  %v1651_v7 = vrot.slane %v5862_v36, %v4150_v28  ;;  %v5864_v36 = vmax.f32 %v4156_v31, 0.0  ;;  %v1530_v6 = vsel %vm1400_vm0, %v1529_v37, %v1525_v55  ;;  %v5866_v46 = vmax.f32 %v4370_v45, 0.0 }
 0x23d   : > { %v1534_v61 = vrot.slane %v5690_v57, %v4150_v28  ;;  %v1520_v37 = vrot.slane %v5691_v59, %v4240_v27 }
 0x23e   : > { %v1652_v20 = vsel %vm1407_vm1, %v1651_v7, %v1647_v51  ;;  %v1515_v2 = vrot.slane %v5864_v36, %v4192_v18  ;;  %v1681_v10 = vrot.slane %v5866_v46, %v4144_v24  ;;  %v5867_v7 = vmax.f32 %v4372_v60, 0.0 }
 0x23f   : > { %v4404_v53 = vpop.xlane.xlu0 %1193  ;;  %v4406_v26 = vpop.xlane.xlu1 %1195  ;;  %v5868_v24 = vmax.f32 %v4246_v44, 0.0  ;;  %v1535_v55 = vsel %vm1407_vm1, %v1534_v61, %v1530_v6 }
 0x240   : > { %v1685_v51 = vrot.slane %v5867_v7, %v4134_v19  ;;  %v1657_v7 = vsel %vm1414_vm2, %v1656_v3, %v1652_v20  ;;  %v1516_v57 = vsel %vm1435_vm5, %v1515_v2, %v1511_v54  ;;  %v5871_v54 = vmax.f32 %v4307_v23, 0.0 }
 0x241   : > { %v1666_v19 = vrot.slane %v5868_v24, %v4198_v30  ;;  %v1662_v22 = vsel %vm1421_vm3, %v1661_v21, %v1657_v7  ;;  %v5870_v21 = vmax.f32 %v4278_v25, 0.0  ;;  %v5872_v7 = vmax.f32 %v4184_v33, 0.0 }
 0x242   : > { %v1686_v59 = vsel %vm1400_vm0, %v1685_v51, %v1681_v10  ;;  %v1690_v10 = vrot.slane %v5871_v54, %v4150_v28  ;;  %v1521_v46 = vsel %vm1442_vm6, %v1520_v37, %v1516_v57  ;;  %v5875_v57 = vmax.f32 %v4406_v26, 0.0 }
 0x243   : > { %v4440_v63 = vpop.xlane.xlu0 %1189  ;;  %v4442_v36 = vpop.xlane.xlu1 %1259  ;;  %v1539_v6 = vrot.slane %v5870_v21, %v4162_v34  ;;  %v1667_v50 = vsel %vm1428_vm4, %v1666_v19, %v1662_v22  ;;  %v5873_v21 = vmax.f32 %v4309_v13, 0.0 }
 0x244   : > { %v5869_v20 = vmax.f32 %v4440_v63, 0.0  ;;  %v1691_v54 = vsel %vm1407_vm1, %v1690_v10, %v1686_v59  ;;  %v1559_v19 = vrot.slane %v5875_v57, %v4240_v27 }
 0x245   : > { %v1695_v44 = vrot.slane %v5873_v21, %v4162_v34  ;;  %v1540_v51 = vsel %vm1414_vm2, %v1539_v6, %v1535_v55 }
 0x246   : > { %v1544_v24 = vrot.slane %v5869_v20, %v4175_v14  ;;  %v1671_v20 = vrot.slane %v5872_v7, %v4192_v18  ;;  %v5874_v7 = vmax.f32 %v4404_v53, 0.0 }
 0x247   : > { %v4468_v60 = vpop.xlane.xlu0 %1253  ;;  %v4470_v2 = vpop.xlane.xlu1 %1191 }
 0x248   : > { %v5696_v61 = vmax.f32 %v4470_v2, 0.0  ;;  %v1554_v3 = vrot.slane %v5874_v7, %v4192_v18  ;;  %v1545_v22 = vsel %vm1421_vm3, %v1544_v24, %v1540_v51  ;;  %v5876_v37 = vmax.f32 %v4468_v60, 0.0 }
 0x249   : > { %v1633_v24 = vsel %vm1435_vm5, %v4377_v58, %v1628_v29  ;;  %v1672_v51 = vsel %vm1435_vm5, %v1671_v20, %v1667_v50  ;;  %v5878_v50 = vmax.f32 %v4442_v36, 0.0 }
 0x24a   : > { %v1549_v28 = vrot.slane %v5696_v61, %v4198_v30  ;;  %v1700_v59 = vrot.slane %v5876_v37, %v4175_v14  ;;  %v1720_v37 = vsel %vm1719_vm8, %v1521_v46, %v1718_v49  ;;  %v1696_v14 = vsel %vm1414_vm2, %v1695_v44, %v1691_v54 }
 0x24b   : > { %v4504_v10 = vpop.xlane.xlu0 %1257  ;;  %v4506_v55 = vpop.xlane.xlu1 %1255  ;;  %v1599_v44 = vsel %vm1442_vm6, %v4314_v43, %v4322_v35  ;;  %v1715_v46 = vrot.slane %v5878_v50, %v4240_v27  ;;  %v1638_v20 = vsel %vm1442_vm6, %v4411_v52, %v1633_v24  ;;  %v5699_v52 = vmov 0  }
 0x24c   : > { %v1550_v21 = vsel %vm1428_vm4, %v1549_v28, %v1545_v22  ;;  %v5707_v7 = vmax.f32 %v4504_v10, 0.0  ;;  %v5706_v61 = vmax.f32 %v4506_v55, 0.0  ;;  %v1701_v29 = vsel %vm1421_vm3, %v1700_v59, %v1696_v14  ;;  %3584 = vset.pattern.permute.xlu0 %v5699_v52  ;;  %3583 = vset.pattern.permute.xlu1 %v5699_v52 }
 0x24d   : > { %v1555_v57 = vsel %vm1435_vm5, %v1554_v3, %v1550_v21  ;;  %v5877_v3 = vmax.f32 %v4186_v39, 0.0  ;;  %v5703_v24 = vsub.s32 0, %v4130_v17 }
 0x24e   : > { %v1710_v6 = vrot.slane %v5707_v7, %v4192_v18  ;;  %v1705_v28 = vrot.slane %v5706_v61, %v4198_v30  ;;  %v1560_v22 = vsel %vm1442_vm6, %v1559_v19, %v1555_v57 }
 0x24f   : > { %v1676_v58 = vrot.slane %v5877_v3, %v4240_v27  ;;  %v1722_v49 = vsel %vm5782_vm9, %v1560_v22, %v1720_v37  ;;  %v5879_v3 = vmax.f32 %v4065_v47, 0.0  ;;  %v5888_v47 = vmax.f32 %v4107_v4, 0.0 }
 0x250   : > { %v1706_v54 = vsel %vm1428_vm4, %v1705_v28, %v1701_v29  ;;  %v1724_v19 = vsel %vm5781_vm10, %v1599_v44, %v1722_v49  ;;  %v5881_v29 = vmax.f32 %v4055_v42, 0.0  ;;  %v5883_v49 = vmax.f32 %v4083_v56, 0.0 }
 0x251   : > { %v1677_v21 = vsel %vm1442_vm6, %v1676_v58, %v1672_v51  ;;  %v1711_v14 = vsel %vm1435_vm5, %v1710_v6, %v1706_v54  ;;  %v1726_v59 = vsel %vm5780_vm11, %v1638_v20, %v1724_v19  ;;  %v5704_v6 = vsub.s32 1, %v4130_v17 }
 0x252   : > { %v1716_v43 = vsel %vm1442_vm6, %v1715_v46, %v1711_v14  ;;  %v1728_v35 = vsel %vm5779_vm12, %v1677_v21, %v1726_v59  ;;  %v5885_v46 = vld [vmem:[#allocation11_spill] sm:$0xff]  ;;  %v5702_v42 = vsub.s32 2, %v4130_v17  ;;  %v5890_v21 = vld [vmem:[#allocation12_spill] sm:$0xff] }
 0x253   : > { %v1730_v57 = vsel %vm5778_vm13, %v1716_v43, %v1728_v35  ;;  %v5886_v20 = vmax.f32 %v5885_v46, 0.0  ;;  %v5891_v14 = vmax.f32 %v5890_v21, 0.0  ;;  %v5893_v43 = vmax.f32 %v4099_v0, 0.0 }
 0x254   : > { %v1733_v37 = vsel %vm5777_vm14, %v1730_v57, inf  ;;  %v5895_v57 = vld [vmem:[#allocation19_spill] sm:$0xff]  ;;  %v5903_v0 = vmax.f32 %v4115_v8, 0.0  ;;  %v5905_v21 = vmax.f32 %v4067_v48, 0.0  ;;  %v5912_v8 = vmax.f32 %v4156_v31, 0.0 }
 0x255   : > { %1734 = vmin.xlane.f32.xlu0 %v1733_v37  ;;  %v5896_v4 = vmax.f32 %v5895_v57, 0.0  ;;  %v5922_v31 = vmax.f32 %v4276_v38, 0.0 }
 0x2de   : > { %v4551_v51 = vpop.xlane.xlu0 %1734 }
 0x2df   : > { %v1740_v28 = vrot.slane %v4551_v51, %v5703_v24  ;;  %v1744_v22 = vrot.slane %v4551_v51, %v5704_v6  ;;  %v1748_v56 = vrot.slane %v4551_v51, %v5702_v42  ;;  %v5938_v24 = vmax.f32 %v4128_v16, 0.0 }
 0x2e0   : > { %v5712_v16 = vsub.s32 5, %v4130_v17 }
 0x2e1   : > { %v4561_v58 = vsub.f32 %v5879_v3, %v1740_v28  ;;  %v4565_v44 = vsub.f32 %v5881_v29, %v1740_v28  ;;  %v4571_v50 = vsub.f32 %v5883_v49, %v1744_v22  ;;  %v4575_v54 = vsub.f32 %v5886_v20, %v1740_v28  ;;  %v5900_v49 = vld [vmem:[#allocation20_spill] sm:$0xff] }
 0x2e2   : > { %v4582_v19 = vsub.f32 %v5888_v47, %v1744_v22  ;;  %v4586_v59 = vsub.f32 %v5891_v14, %v1740_v28  ;;  %v4595_v35 = vsub.f32 %v5893_v43, %v1744_v22  ;;  %v4599_v37 = vsub.f32 %v5896_v4, %v1740_v28  ;;  %v5909_v4 = vld [vmem:[#allocation16_spill] sm:$0xff] }
 0x2e3   : > { %5880 = vst [vmem:[#allocation46_spill] sm:$0xff] %v4561_v58  ;;  %5882 = vst [vmem:[#allocation47_spill] sm:$0xff] %v4565_v44  ;;  %1909 = vperm.xlu0 %3584, %v4561_v58   ;;  %1906 = vperm.xlu1 %3583, %v4565_v44   ;;  %v5898_v3 = vmax.f32 %v4126_v15, 0.0  ;;  %v5901_v46 = vmax.f32 %v5900_v49, 0.0  ;;  %v4615_v47 = vsub.f32 %v5903_v0, %v1748_v56  ;;  %v5701_v15 = vsub.s32 3, %v4130_v17  ;;  %v5914_v0 = vld [vmem:[#allocation26_spill] sm:$0xff] }
 0x2e4   : > { %5884 = vst [vmem:[#allocation48_spill] sm:$0xff] %v4571_v50  ;;  %5887 = vst [vmem:[#allocation11_spill] sm:$0xff] %v4575_v54  ;;  %v4619_v14 = vsub.f32 %v5905_v21, %v1740_v28  ;;  %v5907_v43 = vmax.f32 %v4215_v40, 0.0  ;;  %v5915_v40 = vmax.f32 %v5914_v0, 0.0  ;;  %v5924_v0 = vld [vmem:[#allocation23_spill] sm:$0xff]  ;;  %v4697_v6 = vsub.f32 %v5938_v24, %v1748_v56  ;;  %v5945_v24 = vld [vmem:[#allocation21_spill] sm:$0xff] }
 0x2e5   : > { %5889 = vst [vmem:[#allocation49_spill] sm:$0xff] %v4582_v19  ;;  %5892 = vst [vmem:[#allocation12_spill] sm:$0xff] %v4586_v59  ;;  %v4605_v29 = vsub.f32 %v5898_v3, %v1748_v56  ;;  %v4609_v20 = vsub.f32 %v5901_v46, %v1740_v28  ;;  %v5910_v3 = vmax.f32 %v5909_v4, 0.0  ;;  %v1752_v48 = vrot.slane %v4551_v51, %v5701_v15  ;;  %v5919_v4 = vld [vmem:[#allocation27_spill] sm:$0xff] }
 0x2e6   : > { %5894 = vst [vmem:[#allocation50_spill] sm:$0xff] %v4595_v35  ;;  %5897 = vst [vmem:[#allocation19_spill] sm:$0xff] %v4599_v37  ;;  %v4626_v57 = vsub.f32 %v5907_v43, %v1748_v56  ;;  %v4639_v46 = vsub.f32 %v5912_v8, %v1748_v56  ;;  %v4643_v21 = vsub.f32 %v5915_v40, %v1744_v22  ;;  %v5925_v40 = vmax.f32 %v5924_v0, 0.0 }
 0x2e7   : > { %1936 = vperm.xlu0 %3584, %v4571_v50   ;;  %1912 = vperm.xlu1 %3583, %v4575_v54   ;;  %5899 = vst [vmem:[#allocation51_spill] sm:$0xff] %v4605_v29  ;;  %5902 = vst [vmem:[#allocation20_spill] sm:$0xff] %v4609_v20  ;;  %v4630_v49 = vsub.f32 %v5910_v3, %v1740_v28  ;;  %v5917_v28 = vmax.f32 %v4338_v62, 0.0  ;;  %v5920_v3 = vmax.f32 %v5919_v4, 0.0  ;;  %v5705_v62 = vsub.s32 4, %v4130_v17  ;;  %v6041_v54 = vld [vmem:[#allocation39_spill] sm:$0xff] }
 0x2e8   : > { %5904 = vst [vmem:[#allocation52_spill] sm:$0xff] %v4615_v47  ;;  %5906 = vst [vmem:[#allocation53_spill] sm:$0xff] %v4619_v14  ;;  %v4659_v8 = vsub.f32 %v5922_v31, %v1752_v48  ;;  %v4663_v15 = vsub.f32 %v5925_v40, %v1744_v22  ;;  %v5931_v31 = vmax.f32 %v4404_v53, 0.0  ;;  %v5940_v53 = vld [vmem:[#allocation10_spill] sm:$0xff] }
 0x2e9   : > { %5908 = vst [vmem:[#allocation54_spill] sm:$0xff] %v4626_v57  ;;  %5911 = vst [vmem:[#allocation16_spill] sm:$0xff] %v4630_v49  ;;  %v4649_v43 = vsub.f32 %v5917_v28, %v1752_v48  ;;  %v4653_v52 = vsub.f32 %v5920_v3, %v1744_v22  ;;  %v5927_v28 = vmax.f32 %v4440_v63, 0.0  ;;  %v5929_v3 = vmax.f32 %v4109_v5, 0.0  ;;  %v5935_v5 = vld [vmem:[#allocation13_spill] sm:$0xff] }
 0x2ea   : > { %5913 = vst [vmem:[#allocation55_spill] sm:$0xff] %v4639_v46  ;;  %5916 = vst [vmem:[#allocation26_spill] sm:$0xff] %v4643_v21  ;;  %v1756_v38 = vrot.slane %v4551_v51, %v5705_v62  ;;  %v4683_v0 = vsub.f32 %v5931_v31, %v1752_v48  ;;  %v5933_v63 = vmax.f32 %v4101_v1, 0.0  ;;  %v5941_v1 = vmax.f32 %v5940_v53, 0.0  ;;  %v5948_v62 = vld [vmem:[#allocation42_spill] sm:$0xff]  ;;  %v5951_v53 = vld [vmem:[#allocation17_spill] sm:$0xff] }
 0x2eb   : > { %1942 = vperm.xlu0 %3584, %v4582_v19   ;;  %1915 = vperm.xlu1 %3583, %v4586_v59   ;;  %5918 = vst [vmem:[#allocation56_spill] sm:$0xff] %v4649_v43  ;;  %5921 = vst [vmem:[#allocation27_spill] sm:$0xff] %v4653_v52  ;;  %v4670_v4 = vsub.f32 %v5927_v28, %v1752_v48  ;;  %v4674_v42 = vsub.f32 %v5929_v3, %v1744_v22  ;;  %v5936_v28 = vmax.f32 %v5935_v5, 0.0 }
 0x2ec   : > { %5923 = vst [vmem:[#allocation57_spill] sm:$0xff] %v4659_v8  ;;  %5926 = vst [vmem:[#allocation23_spill] sm:$0xff] %v4663_v15  ;;  %v4687_v40 = vsub.f32 %v5933_v63, %v1744_v22  ;;  %v4703_v22 = vsub.f32 %v5941_v1, %v1756_v38  ;;  %v5943_v31 = vmax.f32 %v4117_v9, 0.0  ;;  %v5946_v5 = vmax.f32 %v5945_v24, 0.0 }
 0x2ed   : > { %5928 = vst [vmem:[#allocation58_spill] sm:$0xff] %v4670_v4  ;;  %5930 = vst [vmem:[#allocation59_spill] sm:$0xff] %v4674_v42  ;;  %v4693_v3 = vsub.f32 %v5936_v28, %v1756_v38  ;;  %v5949_v61 = vmax.f32 %v5948_v62, 0.0  ;;  %v1760_v9 = vrot.slane %v4551_v51, %v5712_v16  ;;  %v5952_v1 = vmax.f32 %v5951_v53, 0.0  ;;  %v5962_v53 = vld [vmem:[#allocation24_spill] sm:$0xff] }
 0x2ee   : > { %5932 = vst [vmem:[#allocation60_spill] sm:$0xff] %v4683_v0  ;;  %5934 = vst [vmem:[#allocation61_spill] sm:$0xff] %v4687_v40  ;;  %v4707_v63 = vsub.f32 %v5943_v31, %v1748_v56  ;;  %v4714_v28 = vsub.f32 %v5946_v5, %v1756_v38  ;;  %v5954_v24 = vmax.f32 %v4158_v32, 0.0  ;;  %v5963_v32 = vmax.f32 %v5962_v53, 0.0  ;;  %v5972_v53 = vld [vmem:[#allocation30_spill] sm:$0xff] }
 0x2ef   : > { %1948 = vperm.xlu0 %3584, %v4595_v35   ;;  %1918 = vperm.xlu1 %3583, %v4599_v37   ;;  %5937 = vst [vmem:[#allocation13_spill] sm:$0xff] %v4693_v3  ;;  %5939 = vst [vmem:[#allocation62_spill] sm:$0xff] %v4697_v6  ;;  %v4718_v7 = vsub.f32 %v5949_v61, %v1748_v56  ;;  %v4727_v31 = vsub.f32 %v5952_v1, %v1756_v38  ;;  %v5956_v61 = vld [vmem:[#allocation28_spill] sm:$0xff]  ;;  %v5965_v1 = vmax.f32 %v4278_v25, 0.0 }
 0x2f0   : > { %5942 = vst [vmem:[#allocation10_spill] sm:$0xff] %v4703_v22  ;;  %5944 = vst [vmem:[#allocation63_spill] sm:$0xff] %v4707_v63  ;;  %v4731_v5 = vsub.f32 %v5954_v24, %v1748_v56  ;;  %v5957_v62 = vmax.f32 %v5956_v61, 0.0  ;;  %v4747_v56 = vsub.f32 %v5963_v32, %v1760_v9  ;;  %v5970_v16 = vmax.f32 %v4470_v2, 0.0  ;;  %v5977_v2 = vld [vmem:[#allocation37_spill] sm:$0xff]  ;;  %v6039_v37 = vld [vmem:[#allocation36_spill] sm:$0xff] }
 0x2f1   : > { %5947 = vst [vmem:[#allocation21_spill] sm:$0xff] %v4714_v28  ;;  %5950 = vst [vmem:[#allocation42_spill] sm:$0xff] %v4718_v7  ;;  %v4751_v24 = vsub.f32 %v5965_v1, %v1752_v48  ;;  %v5973_v32 = vmax.f32 %v5972_v53, 0.0  ;;  %v5985_v53 = vld [vmem:[#allocation14_spill] sm:$0xff]  ;;  %v6043_v35 = vld [vmem:[#allocation40_spill] sm:$0xff] }
 0x2f2   : > { %5953 = vst [vmem:[#allocation17_spill] sm:$0xff] %v4727_v31  ;;  %5955 = vst [vmem:[#allocation64_spill] sm:$0xff] %v4731_v5 }
 0x2f3   : > { %1954 = vperm.xlu0 %3584, %v4605_v29   ;;  %1921 = vperm.xlu1 %3583, %v4609_v20   ;;  %5964 = vst [vmem:[#allocation24_spill] sm:$0xff] %v4747_v56  ;;  %5966 = vst [vmem:[#allocation65_spill] sm:$0xff] %v4751_v24  ;;  %v4771_v1 = vsub.f32 %v5973_v32, %v1760_v9  ;;  %v5986_v32 = vmax.f32 %v5985_v53, 0.0 }
 0x2f5   : > { %5974 = vst [vmem:[#allocation30_spill] sm:$0xff] %v4771_v1 }
 0x2f7   : > { %1960 = vperm.xlu0 %3584, %v4615_v47   ;;  %1924 = vperm.xlu1 %3583, %v4619_v14  }
 0x2fb   : > { %1966 = vperm.xlu0 %3584, %v4626_v57   ;;  %1927 = vperm.xlu1 %3583, %v4630_v49  }
 0x2ff   : > { %1972 = vperm.xlu0 %3584, %v4639_v46   ;;  %1930 = vperm.xlu1 %3583, %v4643_v21  }
 0x303   : > { %1978 = vperm.xlu0 %3584, %v4649_v43   ;;  %1933 = vperm.xlu1 %3583, %v4653_v52  }
 0x307   : > { %1984 = vperm.xlu0 %3584, %v4659_v8   ;;  %1939 = vperm.xlu1 %3583, %v4663_v15  }
 0x30b   : > { %1990 = vperm.xlu0 %3584, %v4670_v4   ;;  %1945 = vperm.xlu1 %3583, %v4674_v42  }
 0x30f   : > { %1996 = vperm.xlu0 %3584, %v4683_v0   ;;  %1951 = vperm.xlu1 %3583, %v4687_v40  }
 0x313   : > { %2002 = vperm.xlu0 %3584, %v4693_v3   ;;  %1957 = vperm.xlu1 %3583, %v4697_v6  }
 0x317   : > { %2008 = vperm.xlu0 %3584, %v4703_v22   ;;  %1963 = vperm.xlu1 %3583, %v4707_v63  }
 0x31b   : > { %2014 = vperm.xlu0 %3584, %v4714_v28   ;;  %1969 = vperm.xlu1 %3583, %v4718_v7   ;;  %v4737_v28 = vsub.f32 %v5957_v62, %v1760_v9  ;;  %v5959_v7 = vld [vmem:[#allocation44_spill] sm:$0xff] }
 0x31c   : > { %v5960_v63 = vmax.f32 %v5959_v7, 0.0  ;;  %v5718_v7 = vsub.s32 6, %v4130_v17 }
 0x31d   : > { %5958 = vst [vmem:[#allocation28_spill] sm:$0xff] %v4737_v28 }
 0x31e   : > { %v4741_v6 = vsub.f32 %v5960_v63, %v1752_v48  ;;  %v5967_v63 = vld [vmem:[#allocation32_spill] sm:$0xff]  ;;  %v1764_v25 = vrot.slane %v4551_v51, %v5718_v7 }
 0x31f   : > { %2020 = vperm.xlu0 %3584, %v4727_v31   ;;  %1975 = vperm.xlu1 %3583, %v4731_v5   ;;  %v5968_v61 = vmax.f32 %v5967_v63, 0.0  ;;  %v4762_v31 = vsub.f32 %v5970_v16, %v1752_v48  ;;  %v5975_v63 = vmax.f32 %v4406_v26, 0.0  ;;  %v5978_v16 = vmax.f32 %v5977_v2, 0.0 }
 0x320   : > { %5961 = vst [vmem:[#allocation44_spill] sm:$0xff] %v4741_v6  ;;  %v5983_v26 = vmax.f32 %v4119_v11, 0.0 }
 0x321   : > { %v4758_v62 = vsub.f32 %v5968_v61, %v1760_v9  ;;  %5971 = vst [vmem:[#allocation66_spill] sm:$0xff] %v4762_v31  ;;  %v4775_v61 = vsub.f32 %v5975_v63, %v1752_v48  ;;  %v4795_v63 = vsub.f32 %v5986_v32, %v1756_v38  ;;  %v5995_v32 = vld [vmem:[#allocation18_spill] sm:$0xff] }
 0x322   : > { %v4791_v48 = vsub.f32 %v5983_v26, %v1764_v25  ;;  %v5993_v26 = vmax.f32 %v4184_v33, 0.0  ;;  %v6003_v33 = vmax.f32 %v4307_v23, 0.0  ;;  %v6013_v23 = vmax.f32 %v4504_v10, 0.0  ;;  %v6023_v10 = vld [vmem:[#allocation43_spill] sm:$0xff] }
 0x323   : > { %2026 = vperm.xlu0 %3584, %v4737_v28   ;;  %1981 = vperm.xlu1 %3583, %v4741_v6   ;;  %5969 = vst [vmem:[#allocation32_spill] sm:$0xff] %v4758_v62  ;;  %5976 = vst [vmem:[#allocation67_spill] sm:$0xff] %v4775_v61 }
 0x324   : > { %5984 = vst [vmem:[#allocation68_spill] sm:$0xff] %v4791_v48  ;;  %5987 = vst [vmem:[#allocation14_spill] sm:$0xff] %v4795_v63  ;;  %v4815_v53 = vsub.f32 %v5993_v26, %v1764_v25 }
 0x326   : > { %5994 = vst [vmem:[#allocation70_spill] sm:$0xff] %v4815_v53 }
 0x327   : > { %2032 = vperm.xlu0 %3584, %v4747_v56   ;;  %1987 = vperm.xlu1 %3583, %v4751_v24  }
 0x32b   : > { %2038 = vperm.xlu0 %3584, %v4758_v62   ;;  %1993 = vperm.xlu1 %3583, %v4762_v31   ;;  %v4781_v62 = vsub.f32 %v5978_v16, %v1764_v25  ;;  %v5980_v31 = vld [vmem:[#allocation15_spill] sm:$0xff]  ;;  %v5990_v16 = vld [vmem:[#allocation22_spill] sm:$0xff] }
 0x32c   : > { %v5981_v24 = vmax.f32 %v5980_v31, 0.0  ;;  %v5723_v31 = vsub.s32 7, %v4130_v17  ;;  %v5991_v7 = vmax.f32 %v5990_v16, 0.0 }
 0x32d   : > { %5979 = vst [vmem:[#allocation37_spill] sm:$0xff] %v4781_v62 }
 0x32e   : > { %v4785_v6 = vsub.f32 %v5981_v24, %v1756_v38  ;;  %v5988_v24 = vmax.f32 %v4244_v41, 0.0  ;;  %v1768_v11 = vrot.slane %v4551_v51, %v5723_v31  ;;  %v5996_v41 = vmax.f32 %v5995_v32, 0.0 }
 0x32f   : > { %2044 = vperm.xlu0 %3584, %v4771_v1   ;;  %1999 = vperm.xlu1 %3583, %v4775_v61   ;;  %v4806_v1 = vsub.f32 %v5991_v7, %v1756_v38  ;;  %v5998_v7 = vmax.f32 %v4370_v45, 0.0  ;;  %v6008_v45 = vmax.f32 %v4468_v60, 0.0  ;;  %v6018_v60 = vld [vmem:[#allocation38_spill] sm:$0xff] }
 0x330   : > { %5982 = vst [vmem:[#allocation15_spill] sm:$0xff] %v4785_v6  ;;  %v4802_v2 = vsub.f32 %v5988_v24, %v1764_v25  ;;  %v4819_v24 = vsub.f32 %v5996_v41, %v1756_v38  ;;  %v4835_v51 = vsub.f32 %v6003_v33, %v1768_v11  ;;  %v6005_v38 = vld [vmem:[#allocation25_spill] sm:$0xff]  ;;  %v4855_v33 = vsub.f32 %v6013_v23, %v1768_v11 }
 0x331   : > { %5992 = vst [vmem:[#allocation22_spill] sm:$0xff] %v4806_v1  ;;  %v4825_v16 = vsub.f32 %v5998_v7, %v1768_v11  ;;  %v6006_v26 = vmax.f32 %v6005_v38, 0.0  ;;  %v6015_v38 = vld [vmem:[#allocation31_spill] sm:$0xff]  ;;  %v6024_v23 = vmax.f32 %v6023_v10, 0.0 }
 0x332   : > { %5989 = vst [vmem:[#allocation69_spill] sm:$0xff] %v4802_v2  ;;  %5997 = vst [vmem:[#allocation18_spill] sm:$0xff] %v4819_v24 }
 0x333   : > { %2050 = vperm.xlu0 %3584, %v4781_v62   ;;  %2005 = vperm.xlu1 %3583, %v4785_v6   ;;  %5999 = vst [vmem:[#allocation71_spill] sm:$0xff] %v4825_v16  ;;  %6004 = vst [vmem:[#allocation72_spill] sm:$0xff] %v4835_v51  ;;  %v4839_v32 = vsub.f32 %v6006_v26, %v1760_v9  ;;  %v6016_v26 = vmax.f32 %v6015_v38, 0.0  ;;  %v6026_v38 = vmax.f32 %v4186_v39, 0.0  ;;  %v6031_v39 = vmax.f32 %v4309_v13, 0.0 }
 0x334   : > { %6014 = vst [vmem:[#allocation74_spill] sm:$0xff] %v4855_v33  ;;  %v6035_v13 = vmax.f32 %v4442_v36, 0.0 }
 0x335   : > { %6007 = vst [vmem:[#allocation25_spill] sm:$0xff] %v4839_v32  ;;  %v4859_v31 = vsub.f32 %v6016_v26, %v1760_v9  ;;  %v4880_v26 = vsub.f32 %v6026_v38, %v1764_v25 }
 0x337   : > { %2056 = vperm.xlu0 %3584, %v4791_v48   ;;  %2011 = vperm.xlu1 %3583, %v4795_v63   ;;  %6017 = vst [vmem:[#allocation31_spill] sm:$0xff] %v4859_v31  ;;  %6027 = vst [vmem:[#allocation76_spill] sm:$0xff] %v4880_v26 }
 0x33b   : > { %2062 = vperm.xlu0 %3584, %v4802_v2   ;;  %2017 = vperm.xlu1 %3583, %v4806_v1   ;;  %v6000_v2 = vld [vmem:[#allocation29_spill] sm:$0xff] }
 0x33c   : > { %v6001_v1 = vmax.f32 %v6000_v2, 0.0  ;;  %v6010_v2 = vld [vmem:[#allocation33_spill] sm:$0xff] }
 0x33d   : > { %v6011_v41 = vmax.f32 %v6010_v2, 0.0 }
 0x33e   : > { %v4829_v61 = vsub.f32 %v6001_v1, %v1760_v9  ;;  %v4845_v1 = vsub.f32 %v6008_v45, %v1768_v11  ;;  %v6019_v45 = vmax.f32 %v6018_v60, 0.0 }
 0x33f   : > { %2068 = vperm.xlu0 %3584, %v4815_v53   ;;  %2023 = vperm.xlu1 %3583, %v4819_v24   ;;  %v4849_v7 = vsub.f32 %v6011_v41, %v1760_v9  ;;  %v6021_v41 = vmax.f32 %v4121_v12, 0.0  ;;  %v4875_v9 = vsub.f32 %v6024_v23, %v1764_v25  ;;  %v6028_v12 = vld [vmem:[#allocation45_spill] sm:$0xff] }
 0x340   : > { %6002 = vst [vmem:[#allocation29_spill] sm:$0xff] %v4829_v61  ;;  %6009 = vst [vmem:[#allocation73_spill] sm:$0xff] %v4845_v1  ;;  %v4865_v2 = vsub.f32 %v6019_v45, %v1764_v25 }
 0x341   : > { %6012 = vst [vmem:[#allocation33_spill] sm:$0xff] %v4849_v7  ;;  %v4870_v53 = vsub.f32 %v6021_v41, %v1764_v25  ;;  %6025 = vst [vmem:[#allocation43_spill] sm:$0xff] %v4875_v9  ;;  %v6029_v41 = vmax.f32 %v6028_v12, 0.0  ;;  %v4898_v25 = vsub.f32 %v6031_v39, %v1768_v11  ;;  %v6033_v12 = vmax.f32 %v4506_v55, 0.0 }
 0x342   : > { %6020 = vst [vmem:[#allocation38_spill] sm:$0xff] %v4865_v2  ;;  %v4916_v39 = vsub.f32 %v6035_v13, %v1768_v11 }
 0x343   : > { %2074 = vperm.xlu0 %3584, %v4825_v16   ;;  %2029 = vperm.xlu1 %3583, %v4829_v61   ;;  %6022 = vst [vmem:[#allocation75_spill] sm:$0xff] %v4870_v53  ;;  %6032 = vst [vmem:[#allocation77_spill] sm:$0xff] %v4898_v25 }
 0x344   : > { %6036 = vst [vmem:[#allocation79_spill] sm:$0xff] %v4916_v39 }
 0x347   : > { %2080 = vperm.xlu0 %3584, %v4835_v51   ;;  %2035 = vperm.xlu1 %3583, %v4839_v32  }
 0x34b   : > { %2086 = vperm.xlu0 %3584, %v4845_v1   ;;  %2041 = vperm.xlu1 %3583, %v4849_v7  }
 0x34f   : > { %2092 = vperm.xlu0 %3584, %v4855_v33   ;;  %2047 = vperm.xlu1 %3583, %v4859_v31   ;;  %v4889_v33 = vsub.f32 %v6029_v41, %v1768_v11  ;;  %v4907_v41 = vsub.f32 %v6033_v12, %v1768_v11 }
 0x351   : > { %6030 = vst [vmem:[#allocation45_spill] sm:$0xff] %v4889_v33  ;;  %6034 = vst [vmem:[#allocation78_spill] sm:$0xff] %v4907_v41 }
 0x353   : > { %2053 = vperm.xlu1 %3583, %v4865_v2  }
 0x357   : > { %2059 = vperm.xlu1 %3583, %v4870_v53  }
 0x35b   : > { %2065 = vperm.xlu1 %3583, %v4875_v9  }
 0x35e   : > { %v4882_v60 = vpop.permute.xlu0 %1909  ;;  %v4884_v45 = vpop.permute.xlu1 %1906 }
 0x35f   : > { %2071 = vperm.xlu1 %3583, %v4880_v26   ;;  %v2104_v47 = vrot.slane %v4882_v60, %v6039_v37  ;;  %v2100_v29 = vrot.slane %v4884_v45, %v6041_v54 }
 0x361   : > { %v2105_v60 = vsel %vm1400_vm0, %v2104_v47, %v2100_v29 }
 0x362   : > { %v4891_v31 = vpop.permute.xlu0 %1936  ;;  %v4893_v10 = vpop.permute.xlu1 %1912 }
 0x363   : > { %2077 = vperm.xlu1 %3583, %v4889_v33   ;;  %v2109_v44 = vrot.slane %v4893_v10, %v6043_v35  ;;  %v2148_v45 = vrot.slane %v4891_v31, %v6043_v35 }
 0x366   : > { %v4900_v23 = vpop.permute.xlu0 %1942  ;;  %v4902_v38 = vpop.permute.xlu1 %1915 }
 0x367   : > { %2083 = vperm.xlu1 %3583, %v4898_v25   ;;  %v2114_v17 = vrot.slane %v4902_v38, %v4162_v34  ;;  %v2110_v38 = vsel %vm1407_vm1, %v2109_v44, %v2105_v60 }
 0x369   : > { %v2115_v29 = vsel %vm1414_vm2, %v2114_v17, %v2110_v38 }
 0x36a   : > { %v4909_v26 = vpop.permute.xlu0 %1948  ;;  %v4911_v1 = vpop.permute.xlu1 %1918 }
 0x36b   : > { %2089 = vperm.xlu1 %3583, %v4907_v41  }
 0x36e   : > { %v4918_v9 = vpop.permute.xlu0 %1954  ;;  %v4920_v24 = vpop.permute.xlu1 %1921 }
 0x36f   : > { %2095 = vperm.xlu1 %3583, %v4916_v39   ;;  %v2178_v10 = vrot.slane %v4918_v9, %v6041_v54 }
 0x372   : > { %v4923_v25 = vpop.permute.xlu0 %1960  ;;  %v4925_v55 = vpop.permute.xlu1 %1924 }
 0x376   : > { %v4927_v12 = vpop.permute.xlu0 %1966  ;;  %v4929_v7 = vpop.permute.xlu1 %1927 }
 0x377   : > { %v2134_v9 = vrot.slane %v4929_v7, %v4240_v27 }
 0x37a   : > { %v4931_v51 = vpop.permute.xlu0 %1972  ;;  %v1931_v41 = vpop.permute.xlu1 %1930 }
 0x37b   : > { %v2139_v21 = vrot.slane %v1931_v41, %v6041_v54 }
 0x37e   : > { %v4933_v36 = vpop.permute.xlu0 %1978  ;;  %v1934_v11 = vpop.permute.xlu1 %1933 }
 0x37f   : > { %v2143_v57 = vrot.slane %v1934_v11, %v6039_v37 }
 0x382   : > { %v4935_v13 = vpop.permute.xlu0 %1984  ;;  %v1940_v53 = vpop.permute.xlu1 %1939 }
 0x386   : > { %v4937_v32 = vpop.permute.xlu0 %1990  ;;  %v4939_v39 = vpop.permute.xlu1 %1945 }
 0x38a   : > { %v4941_v33 = vpop.permute.xlu0 %1996  ;;  %v4943_v16 = vpop.permute.xlu1 %1951 }
 0x38e   : > { %v4945_v48 = vpop.permute.xlu0 %2002  ;;  %v1958_v2 = vpop.permute.xlu1 %1957 }
 0x38f   : > { %v2182_v11 = vrot.slane %v1958_v2, %v6039_v37  ;;  %v2129_v2 = vrot.slane %v4925_v55, %v4192_v18 }
 0x391   : > { %v2183_v31 = vsel %vm1400_vm0, %v2182_v11, %v2178_v10 }
 0x392   : > { %v1964_v5 = vpop.permute.xlu1 %1963  ;;  %v4947_v62 = vpop.permute.xlu0 %2008 }
 0x396   : > { %v4949_v56 = vpop.permute.xlu1 %1969  ;;  %v4951_v63 = vpop.permute.xlu0 %2014 }
 0x39a   : > { %v4953_v61 = vpop.permute.xlu1 %1975  ;;  %v4957_v28 = vpop.permute.xlu0 %2020 }
 0x39e   : > { %v4955_v40 = vpop.permute.xlu1 %1981  ;;  %v4961_v22 = vpop.permute.xlu0 %2026 }
 0x3a2   : > { %v4959_v42 = vpop.permute.xlu1 %1987  ;;  %v4967_v15 = vpop.permute.xlu0 %2032 }
 0x3a6   : > { %v4963_v19 = vpop.permute.xlu1 %1993  ;;  %v4971_v50 = vpop.permute.xlu0 %2038 }
 0x3aa   : > { %v4965_v6 = vpop.permute.xlu1 %1999  ;;  %v4977_v4 = vpop.permute.xlu0 %2044 }
 0x3ab   : > { %6037 = vst [vmem:[#allocation80_spill] sm:$0xff] %v4977_v4  ;;  %v2144_v4 = vsel %vm1400_vm0, %v2143_v57, %v2139_v21  ;;  %v2124_v57 = vrot.slane %v4920_v24, %v4198_v30  ;;  %v2163_v24 = vrot.slane %v4939_v39, %v4198_v30  ;;  %v2217_v39 = vrot.slane %v4933_v36, %v6041_v54 }
 0x3ac   : > { %v2149_v47 = vsel %vm1407_vm1, %v2148_v45, %v2144_v4  ;;  %v2173_v45 = vrot.slane %v4943_v16, %v4240_v27  ;;  %v2168_v36 = vrot.slane %v4909_v26, %v4192_v18  ;;  %v2226_v16 = vrot.slane %v4935_v13, %v6043_v35 }
 0x3ad   : > { %v2212_v13 = vrot.slane %v4953_v61, %v4240_v27  ;;  %v2265_v61 = vrot.slane %v4947_v62, %v6043_v35 }
 0x3ae   : > { %v4969_v3 = vpop.permute.xlu1 %2005  ;;  %v4981_v8 = vpop.permute.xlu0 %2050 }
 0x3b2   : > { %v4973_v0 = vpop.permute.xlu1 %2011  ;;  %v4987_v20 = vpop.permute.xlu0 %2056 }
 0x3b3   : > { %v2270_v62 = vrot.slane %v4973_v0, %v4162_v34 }
 0x3b6   : > { %v4975_v52 = vpop.permute.xlu1 %2017  ;;  %v4992_v59 = vpop.permute.xlu0 %2062 }
 0x3b7   : > { %6040 = vst [vmem:[#allocation36_spill] sm:$0xff] %v4992_v59 }
 0x3ba   : > { %v4979_v49 = vpop.permute.xlu1 %2023  ;;  %v5020_v21 = vpop.permute.xlu0 %2068 }
 0x3bb   : > { %6038 = vst [vmem:[#allocation81_spill] sm:$0xff] %v4979_v49  ;;  %v2153_v49 = vrot.slane %v1940_v53, %v4162_v34  ;;  %v2192_v53 = vrot.slane %v1964_v5, %v4162_v34  ;;  %v2221_v5 = vrot.slane %v4955_v40, %v6039_v37 }
 0x3bd   : > { %v2154_v44 = vsel %vm1414_vm2, %v2153_v49, %v2149_v47 }
 0x3be   : > { %v4983_v14 = vpop.permute.xlu1 %2029  ;;  %v2075_v10 = vpop.permute.xlu0 %2074 }
 0x3c2   : > { %v4985_v43 = vpop.permute.xlu1 %2035 }
 0x3c6   : > { %v4989_v46 = vpop.permute.xlu1 %2041 }
 0x3ca   : > { %v4998_v58 = vpop.permute.xlu1 %2047 }
 0x3cb   : > { %6042 = vst [vmem:[#allocation39_spill] sm:$0xff] %v4998_v58  ;;  %v6044_v58 = vld [vmem:[#allocation41_spill] sm:$0xff] }
 0x3cc   : > { %v2119_v59 = vrot.slane %v4911_v1, %v6044_v58  ;;  %v2187_v1 = vrot.slane %v4923_v25, %v6043_v35  ;;  %v2158_v17 = vrot.slane %v4900_v23, %v6044_v58  ;;  %v2197_v40 = vrot.slane %v4927_v12, %v6044_v58 }
 0x3cd   : > { %v2207_v12 = vrot.slane %v4931_v51, %v4192_v18  ;;  %v2236_v47 = vrot.slane %v4937_v32, %v6044_v58 }
 0x3ce   : > { %v5015_v41 = vpop.permute.xlu1 %2053  ;;  %v2120_v4 = vsel %vm1421_vm3, %v2119_v59, %v2115_v29  ;;  %v2188_v49 = vsel %vm1407_vm1, %v2187_v1, %v2183_v31  ;;  %v2159_v11 = vsel %vm1421_vm3, %v2158_v17, %v2154_v44  ;;  %v2202_v59 = vrot.slane %v4949_v56, %v4198_v30 }
 0x3cf   : > { %v2125_v55 = vsel %vm1428_vm4, %v2124_v57, %v2120_v4  ;;  %v2193_v23 = vsel %vm1414_vm2, %v2192_v53, %v2188_v49  ;;  %v2164_v60 = vsel %vm1428_vm4, %v2163_v24, %v2159_v11  ;;  %v2222_v57 = vsel %vm1400_vm0, %v2221_v5, %v2217_v39 }
 0x3d0   : > { %v2130_v7 = vsel %vm1435_vm5, %v2129_v2, %v2125_v55  ;;  %v2231_v56 = vrot.slane %v4959_v42, %v4162_v34  ;;  %v2198_v26 = vsel %vm1421_vm3, %v2197_v40, %v2193_v23  ;;  %v2246_v31 = vrot.slane %v4941_v33, %v4192_v18 }
 0x3d1   : > { %v5059_v38 = vsel %vm1442_vm6, %v2134_v9, %v2130_v7  ;;  %v2169_v53 = vsel %vm1435_vm5, %v2168_v36, %v2164_v60  ;;  %v2203_v42 = vsel %vm1428_vm4, %v2202_v59, %v2198_v26  ;;  %v2260_v1 = vrot.slane %v4969_v3, %v6039_v37  ;;  %v2081_v9 = vpop.permute.xlu0 %2080  ;;  %v6045_v26 = vld [vmem:[#allocation36_spill] sm:$0xff] }
 0x3d2   : > { %v5040_v25 = vpop.permute.xlu1 %2059  ;;  %v5080_v51 = vsel %vm1442_vm6, %v2173_v45, %v2169_v53  ;;  %v2227_v32 = vsel %vm1407_vm1, %v2226_v16, %v2222_v57  ;;  %v2299_v2 = vrot.slane %v4983_v14, %v6039_v37  ;;  %v2256_v33 = vrot.slane %v4945_v48, %v6041_v54 }
 0x3d3   : > { %v2232_v44 = vsel %vm1414_vm2, %v2231_v56, %v2227_v32  ;;  %v2241_v24 = vrot.slane %v4963_v19, %v4198_v30  ;;  %v2338_v3 = vrot.slane %v5015_v41, %v6039_v37  ;;  %v2275_v4 = vrot.slane %v4951_v63, %v6044_v58 }
 0x3d4   : > { %v2208_v14 = vsel %vm1435_vm5, %v2207_v12, %v2203_v42  ;;  %v2295_v48 = vrot.slane %v4961_v22, %v6041_v54  ;;  %v2285_v19 = vrot.slane %v4957_v28, %v4192_v18  ;;  %v2334_v41 = vrot.slane %v4981_v8, %v6041_v54 }
 0x3d5   : > { %v2261_v5 = vsel %vm1400_vm0, %v2260_v1, %v2256_v33  ;;  %v2213_v55 = vsel %vm1442_vm6, %v2212_v13, %v2208_v14  ;;  %v2237_v63 = vsel %vm1421_vm3, %v2236_v47, %v2232_v44  ;;  %v2309_v22 = vrot.slane %v4985_v43, %v4162_v34  ;;  %v2087_v36 = vpop.permute.xlu0 %2086  ;;  %v6046_v1 = vld [vmem:[#allocation81_spill] sm:$0xff] }
 0x3d6   : > { %v5064_v29 = vpop.permute.xlu1 %2065  ;;  %v2300_v49 = vsel %vm1400_vm0, %v2299_v2, %v2295_v48  ;;  %v2304_v28 = vrot.slane %v4967_v15, %v6043_v35  ;;  %v2242_v39 = vsel %vm1428_vm4, %v2241_v24, %v2237_v63  ;;  %v2339_v8 = vsel %vm1400_vm0, %v2338_v3, %v2334_v41  ;;  %v6048_v3 = vld [vmem:[#allocation80_spill] sm:$0xff] }
 0x3d7   : > { %v2348_v11 = vrot.slane %v5040_v25, %v4162_v34  ;;  %v2343_v23 = vrot.slane %v4987_v20, %v6043_v35  ;;  %v2266_v59 = vsel %vm1407_vm1, %v2265_v61, %v2261_v5  ;;  %v2373_v7 = vrot.slane %v2075_v10, %v6041_v54 }
 0x3d8   : > { %v2314_v15 = vrot.slane %v4971_v50, %v6044_v58  ;;  %v2271_v40 = vsel %vm1414_vm2, %v2270_v62, %v2266_v59  ;;  %v2280_v60 = vrot.slane %v4975_v52, %v4198_v30  ;;  %v2305_v25 = vsel %vm1407_vm1, %v2304_v28, %v2300_v49 }
 0x3d9   : > { %v2310_v45 = vsel %vm1414_vm2, %v2309_v22, %v2305_v25  ;;  %v2319_v20 = vrot.slane %v4989_v46, %v4198_v30  ;;  %v2344_v10 = vsel %vm1407_vm1, %v2343_v23, %v2339_v8  ;;  %v2247_v56 = vsel %vm1435_vm5, %v2246_v31, %v2242_v39  ;;  %v2093_v63 = vpop.permute.xlu0 %2092 }
 0x3da   : > { %v5094_v17 = vpop.permute.xlu1 %2071  ;;  %v2382_v50 = vrot.slane %v2081_v9, %v6043_v35  ;;  %v2349_v12 = vsel %vm1414_vm2, %v2348_v11, %v2344_v10  ;;  %v2358_v52 = vrot.slane %v5064_v29, %v4198_v30  ;;  %v2251_v47 = vrot.slane %v4965_v6, %v4240_v27  ;;  %v6047_v6 = vld [vmem:[#allocation39_spill] sm:$0xff] }
 0x3db   : > { %v2353_v46 = vrot.slane %v6045_v26, %v6044_v58  ;;  %v2276_v53 = vsel %vm1421_vm3, %v2275_v4, %v2271_v40  ;;  %v2290_v13 = vrot.slane %v6046_v1, %v4240_v27  ;;  %v2315_v32 = vsel %vm1421_vm3, %v2314_v15, %v2310_v45  ;;  %v5198_v45 = vld [vmem:[%s322_s17] sm:$0xff] }
 0x3dc   : > { %v2281_v31 = vsel %vm1428_vm4, %v2280_v60, %v2276_v53  ;;  %v2320_v2 = vsel %vm1428_vm4, %v2319_v20, %v2315_v32  ;;  %v2329_v33 = vrot.slane %v6047_v6, %v4240_v27  ;;  %v2324_v61 = vrot.slane %v6048_v3, %v4192_v18  ;;  %v6055_v1 = vld [vmem:[#allocation50_spill] sm:$0xff]  ;;  %v6059_v3 = vld [vmem:[#allocation11_spill] sm:$0xff] }
 0x3dd   : > { %v2354_v44 = vsel %vm1421_vm3, %v2353_v46, %v2349_v12  ;;  %v2392_v4 = vrot.slane %v2087_v36, %v6044_v58  ;;  %v2368_v48 = vrot.slane %v5094_v17, %v4240_v27  ;;  %v2252_v41 = vsel %vm1442_vm6, %v2251_v47, %v2247_v56  ;;  %v6049_v56 = vld [vmem:[#allocation35_spill] sm:$0xff]  ;;  %v6053_v46 = vld [vmem:[#allocation26_spill] sm:$0xff] }
 0x3de   : > { %v2078_v0 = vpop.permute.xlu1 %2077  ;;  %v2359_v14 = vsel %vm1428_vm4, %v2358_v52, %v2354_v44  ;;  %v2363_v5 = vrot.slane %v5020_v21, %v4192_v18  ;;  %v2286_v62 = vsel %vm1435_vm5, %v2285_v19, %v2281_v31  ;;  %v2409_v22 = vsel %vm1717_vm7, %v5080_v51, %v5059_v38  ;;  %v6056_v32 = vld [vmem:[#allocation46_spill] sm:$0xff]  ;;  %v6058_v44 = vld [vmem:[#allocation51_spill] sm:$0xff] }
 0x3df   : > { %v2377_v43 = vrot.slane %v2078_v0, %v6039_v37  ;;  %v2291_v28 = vsel %vm1442_vm6, %v2290_v13, %v2286_v62  ;;  %v2325_v39 = vsel %vm1435_vm5, %v2324_v61, %v2320_v2  ;;  %v2410_v8 = vsel %vm1719_vm8, %v2213_v55, %v2409_v22 }
 0x3e0   : > { %v2330_v11 = vsel %vm1442_vm6, %v2329_v33, %v2325_v39  ;;  %v2364_v21 = vsel %vm1435_vm5, %v2363_v5, %v2359_v14  ;;  %v2411_v0 = vsel %vm5782_vm9, %v2252_v41, %v2410_v8  ;;  %v2402_v38 = vrot.slane %v2093_v63, %v4192_v18  ;;  %v6061_v41 = vld [vmem:[#allocation12_spill] sm:$0xff] }
 0x3e1   : > { %v2378_v57 = vsel %vm1400_vm0, %v2377_v43, %v2373_v7  ;;  %v2369_v51 = vsel %vm1442_vm6, %v2368_v48, %v2364_v21  ;;  %v2412_v59 = vsel %vm5781_vm10, %v2291_v28, %v2411_v0  ;;  %v3180_v36 = vsel %vm3179_vm15, %v5198_v45, -inf  ;;  %v6060_v48 = vld [vmem:[#allocation52_spill] sm:$0xff]  ;;  %v6063_v28 = vld [vmem:[#allocation19_spill] sm:$0xff] }
 0x3e2   : > { %v2084_v16 = vpop.permute.xlu1 %2083  ;;  %v2383_v29 = vsel %vm1407_vm1, %v2382_v50, %v2378_v57  ;;  %v2413_v43 = vsel %vm5780_vm11, %v2330_v11, %v2412_v59  ;;  %3181 = vmax.xlane.f32.xlu1 %v3180_v36  ;;  %v6050_v50 = vsub.s32 1, %v6049_v56  ;;  %v6051_v52 = vsub.s32 0, %v6049_v56 }
 0x3e3   : > { %v2387_v42 = vrot.slane %v2084_v16, %v4162_v34  ;;  %v2414_v40 = vsel %vm5779_vm12, %v2369_v51, %v2413_v43  ;;  %v6052_v47 = vsub.s32 2, %v6049_v56  ;;  %v6057_v2 = vmov 0   ;;  %v6068_v43 = vld [vmem:[#allocation53_spill] sm:$0xff] }
 0x3e4   : > { %v6064_v11 = vsub.s32 3, %v6049_v56 }
 0x3e5   : > { %v2388_v24 = vsel %vm1414_vm2, %v2387_v42, %v2383_v29  ;;  %v6054_v42 = vld [vmem:[#allocation47_spill] sm:$0xff] }
 0x3e6   : > { %v2090_v9 = vpop.permute.xlu1 %2089  ;;  %v2393_v17 = vsel %vm1421_vm3, %v2392_v4, %v2388_v24 }
 0x3e7   : > { %v2397_v49 = vrot.slane %v2090_v9, %v4198_v30 }
 0x3e9   : > { %v2398_v19 = vsel %vm1428_vm4, %v2397_v49, %v2393_v17  ;;  %v6062_v49 = vld [vmem:[#allocation54_spill] sm:$0xff] }
 0x3ea   : > { %v2096_v23 = vpop.permute.xlu1 %2095  ;;  %v2403_v55 = vsel %vm1435_vm5, %v2402_v38, %v2398_v19  ;;  %v6065_v19 = vld [vmem:[#allocation55_spill] sm:$0xff]  ;;  %v6066_v38 = vld [vmem:[#allocation20_spill] sm:$0xff] }
 0x3eb   : > { %v2407_v7 = vrot.slane %v2096_v23, %v4240_v27 }
 0x3ed   : > { %v2408_v15 = vsel %vm1442_vm6, %v2407_v7, %v2403_v55  ;;  %v6067_v7 = vld [vmem:[#allocation56_spill] sm:$0xff] }
 0x3ee   : > { %v2415_v60 = vsel %vm5778_vm13, %v2408_v15, %v2414_v40 }
 0x3ef   : > { %v2417_v25 = vsel %vm5777_vm14, %v2415_v60, -inf }
 0x3f0   : > { %2418 = vmax.xlane.f32.xlu0 %v2417_v25  ;;  %v6069_v25 = vld [vmem:[#allocation57_spill] sm:$0xff] }
 0x479   : > { %v2419_v20 = vpop.xlane.xlu0 %2418 }
 0x47a   : > { %v2420_v10 = vadd.f32 1e-07, %v2419_v20  ;;  %v6070_v20 = vld [vmem:[#allocation16_spill] sm:$0xff] }
 0x47c   : > { %3625 = vrcp.f32 %v2420_v10 }
 0x489   : > { %v5202_v57 = vpop.eup %3625 }
 0x48a   : > { %v5207_v12 = vrot.slane %v5202_v57, %v6050_v50  ;;  %v2426_v16 = vrot.slane %v5202_v57, %v6051_v52  ;;  %v5215_v26 = vrot.slane %v5202_v57, %v6052_v47  ;;  %v5243_v21 = vrot.slane %v5202_v57, %v6064_v11  ;;  %v6071_v47 = vld [vmem:[#allocation58_spill] sm:$0xff]  ;;  %v6082_v11 = vld [vmem:[#allocation59_spill] sm:$0xff] }
 0x48c   : > { %v2471_v53 = vmul.f32 %v5207_v12, %v6053_v46  ;;  %v2463_v31 = vmul.f32 %v2426_v16, %v6054_v42  ;;  %v2477_v13 = vmul.f32 %v5207_v12, %v6055_v1  ;;  %v2464_v29 = vmul.f32 %v2426_v16, %v6056_v32  ;;  %v6074_v32 = vld [vmem:[#allocation60_spill] sm:$0xff] }
 0x48d   : > { %v2479_v24 = vmul.f32 %v5215_v26, %v6058_v44  ;;  %v2465_v61 = vmul.f32 %v2426_v16, %v6059_v3  ;;  %v2481_v9 = vmul.f32 %v5215_v26, %v6060_v48  ;;  %v2466_v5 = vmul.f32 %v2426_v16, %v6061_v41  ;;  %v6076_v3 = vld [vmem:[#allocation13_spill] sm:$0xff]  ;;  %v6078_v41 = vld [vmem:[#allocation15_spill] sm:$0xff] }
 0x48e   : > { %vm2536_vm14 = vcmp.gt.f32.partialorder %v2471_v53, 0.5  ;;  %vm2528_vm13 = vcmp.gt.f32.partialorder %v2463_v31, 0.5  ;;  %vm2542_vm12 = vcmp.gt.f32.partialorder %v2477_v13, 0.5  ;;  %vm2529_vm11 = vcmp.gt.f32.partialorder %v2464_v29, 0.5  ;;  %v6072_v53 = vld [vmem:[#allocation27_spill] sm:$0xff] }
 0x48f   : > { %v2600_v6 = vsel %vm2536_vm14, 1, %v6057_v2  ;;  %v2592_v33 = vsel %vm2528_vm13, 1, %v6057_v2  ;;  %v2606_v4 = vsel %vm2542_vm12, 1, %v6057_v2  ;;  %v2593_v14 = vsel %vm2529_vm11, 1, %v6057_v2 }
 0x490   : > { %2681 = vperm.xlu0 %3584, %v2600_v6   ;;  %2657 = vperm.xlu1 %3583, %v2592_v33   ;;  %vm2544_vm10 = vcmp.gt.f32.partialorder %v2479_v24, 0.5  ;;  %vm2530_vm9 = vcmp.gt.f32.partialorder %v2465_v61, 0.5  ;;  %vm2546_vm13 = vcmp.gt.f32.partialorder %v2481_v9, 0.5  ;;  %vm2531_vm14 = vcmp.gt.f32.partialorder %v2466_v5, 0.5  ;;  %v6075_v6 = vld [vmem:[#allocation48_spill] sm:$0xff] }
 0x491   : > { %v2608_v62 = vsel %vm2544_vm10, 1, %v6057_v2  ;;  %v2594_v63 = vsel %vm2530_vm9, 1, %v6057_v2  ;;  %v2483_v22 = vmul.f32 %v5215_v26, %v6062_v49  ;;  %v2467_v39 = vmul.f32 %v2426_v16, %v6063_v28 }
 0x492   : > { %v2610_v17 = vsel %vm2546_vm13, 1, %v6057_v2  ;;  %v2595_v8 = vsel %vm2531_vm14, 1, %v6057_v2  ;;  %v2485_v0 = vmul.f32 %v5215_v26, %v6065_v19  ;;  %v2468_v51 = vmul.f32 %v2426_v16, %v6066_v38 }
 0x493   : > { %vm2548_vm9 = vcmp.gt.f32.partialorder %v2483_v22, 0.5  ;;  %vm2532_vm10 = vcmp.gt.f32.partialorder %v2467_v39, 0.5  ;;  %v2487_v55 = vmul.f32 %v5243_v21, %v6067_v7  ;;  %v2469_v15 = vmul.f32 %v2426_v16, %v6068_v43 }
 0x494   : > { %2699 = vperm.xlu0 %3584, %v2606_v4   ;;  %2660 = vperm.xlu1 %3583, %v2593_v14   ;;  %v2612_v23 = vsel %vm2548_vm9, 1, %v6057_v2  ;;  %v2596_v59 = vsel %vm2532_vm10, 1, %v6057_v2  ;;  %vm2550_vm11 = vcmp.gt.f32.partialorder %v2485_v0, 0.5  ;;  %vm2533_vm12 = vcmp.gt.f32.partialorder %v2468_v51, 0.5  ;;  %v6077_v4 = vld [vmem:[#allocation23_spill] sm:$0xff]  ;;  %v6083_v51 = vld [vmem:[#allocation28_spill] sm:$0xff] }
 0x495   : > { %v2614_v40 = vsel %vm2550_vm11, 1, %v6057_v2  ;;  %v2597_v60 = vsel %vm2533_vm12, 1, %v6057_v2  ;;  %vm2552_vm13 = vcmp.gt.f32.partialorder %v2487_v55, 0.5  ;;  %vm2534_vm14 = vcmp.gt.f32.partialorder %v2469_v15, 0.5  ;;  %v6085_v15 = vld [vmem:[#allocation29_spill] sm:$0xff] }
 0x496   : > { %v2489_v36 = vmul.f32 %v5243_v21, %v6069_v25  ;;  %v2470_v10 = vmul.f32 %v2426_v16, %v6070_v20  ;;  %v2616_v50 = vsel %vm2552_vm13, 1, %v6057_v2  ;;  %v2598_v52 = vsel %vm2534_vm14, 1, %v6057_v2 }
 0x497   : > { %v2491_v46 = vmul.f32 %v5243_v21, %v6071_v47  ;;  %v2472_v42 = vmul.f32 %v5207_v12, %v6072_v53  ;;  %v6073_v16 = vsub.s32 4, %v6049_v56  ;;  %v2493_v29 = vmul.f32 %v5243_v21, %v6074_v32 }
 0x498   : > { %2705 = vperm.xlu0 %3584, %v2608_v62   ;;  %2663 = vperm.xlu1 %3583, %v2594_v63   ;;  %vm2554_vm9 = vcmp.gt.f32.partialorder %v2489_v36, 0.5  ;;  %vm2535_vm10 = vcmp.gt.f32.partialorder %v2470_v10, 0.5  ;;  %v2473_v33 = vmul.f32 %v5207_v12, %v6075_v6  ;;  %v2474_v14 = vmul.f32 %v5207_v12, %v6077_v4  ;;  %v6079_v62 = vld [vmem:[#allocation49_spill] sm:$0xff] }
 0x499   : > { %v2618_v31 = vsel %vm2554_vm9, 1, %v6057_v2  ;;  %v2599_v1 = vsel %vm2535_vm10, 1, %v6057_v2  ;;  %v5269_v13 = vrot.slane %v5202_v57, %v6073_v16  ;;  %vm2556_vm11 = vcmp.gt.f32.partialorder %v2491_v46, 0.5  ;;  %v6091_v16 = vld [vmem:[#allocation42_spill] sm:$0xff] }
 0x49a   : > { %vm2537_vm12 = vcmp.gt.f32.partialorder %v2472_v42, 0.5  ;;  %v2620_v44 = vsel %vm2556_vm11, 1, %v6057_v2  ;;  %vm2558_vm13 = vcmp.gt.f32.partialorder %v2493_v29, 0.5  ;;  %vm2538_vm14 = vcmp.gt.f32.partialorder %v2473_v33, 0.5  ;;  %v6092_v33 = vld [vmem:[#allocation37_spill] sm:$0xff] }
 0x49b   : > { %v2601_v24 = vsel %vm2537_vm12, 1, %v6057_v2  ;;  %v2495_v61 = vmul.f32 %v5269_v13, %v6076_v3  ;;  %v2622_v48 = vsel %vm2558_vm13, 1, %v6057_v2  ;;  %v2602_v9 = vsel %vm2538_vm14, 1, %v6057_v2 }
 0x49c   : > { %2711 = vperm.xlu0 %3584, %v2610_v17   ;;  %2666 = vperm.xlu1 %3583, %v2595_v8   ;;  %vm2539_vm10 = vcmp.gt.f32.partialorder %v2474_v14, 0.5  ;;  %v2496_v5 = vmul.f32 %v5269_v13, %v6078_v41  ;;  %v2475_v63 = vmul.f32 %v5207_v12, %v6079_v62  ;;  %v6080_v28 = vsub.s32 5, %v6049_v56  ;;  %v6081_v17 = vld [vmem:[#allocation10_spill] sm:$0xff] }
 0x49d   : > { %vm2560_vm9 = vcmp.gt.f32.partialorder %v2495_v61, 0.5  ;;  %v2603_v22 = vsel %vm2539_vm10, 1, %v6057_v2  ;;  %v2497_v8 = vmul.f32 %v5269_v13, %v6081_v17  ;;  %v2476_v19 = vmul.f32 %v5207_v12, %v6082_v11  ;;  %v6094_v14 = vld [vmem:[#allocation38_spill] sm:$0xff] }
 0x49e   : > { %v2624_v49 = vsel %vm2560_vm9, 1, %v6057_v2  ;;  %v5292_v39 = vrot.slane %v5202_v57, %v6080_v28  ;;  %vm2561_vm11 = vcmp.gt.f32.partialorder %v2496_v5, 0.5  ;;  %vm2540_vm12 = vcmp.gt.f32.partialorder %v2475_v63, 0.5 }
 0x49f   : > { %v2625_v0 = vsel %vm2561_vm11, 1, %v6057_v2  ;;  %v2604_v38 = vsel %vm2540_vm12, 1, %v6057_v2  ;;  %vm2562_vm13 = vcmp.gt.f32.partialorder %v2497_v8, 0.5  ;;  %vm2541_vm14 = vcmp.gt.f32.partialorder %v2476_v19, 0.5  ;;  %v6099_v19 = vld [vmem:[#allocation68_spill] sm:$0xff] }
 0x4a0   : > { %2717 = vperm.xlu0 %3584, %v2612_v23   ;;  %2669 = vperm.xlu1 %3583, %v2596_v59   ;;  %v2503_v23 = vmul.f32 %v5292_v39, %v6083_v51  ;;  %v6084_v59 = vld [vmem:[#allocation61_spill] sm:$0xff]  ;;  %v2626_v55 = vsel %vm2562_vm13, 1, %v6057_v2  ;;  %v2605_v43 = vsel %vm2541_vm14, 1, %v6057_v2  ;;  %v6089_v53 = vsub.s32 6, %v6049_v56 }
 0x4a1   : > { %v2478_v7 = vmul.f32 %v5207_v12, %v6084_v59  ;;  %v6087_v12 = vld [vmem:[#allocation14_spill] sm:$0xff]  ;;  %v2484_v32 = vmul.f32 %v5215_v26, %v6091_v16  ;;  %v6098_v8 = vsub.s32 7, %v6049_v56 }
 0x4a2   : > { %vm2568_vm9 = vcmp.gt.f32.partialorder %v2503_v23, 0.5  ;;  %v2498_v10 = vmul.f32 %v5269_v13, %v6087_v12  ;;  %v5321_v42 = vrot.slane %v5202_v57, %v6089_v53  ;;  %v6107_v53 = vld [vmem:[#allocation75_spill] sm:$0xff] }
 0x4a3   : > { %vm2543_vm10 = vcmp.gt.f32.partialorder %v2478_v7, 0.5  ;;  %v2632_v36 = vsel %vm2568_vm9, 1, %v6057_v2  ;;  %v5350_v11 = vrot.slane %v5202_v57, %v6098_v8  ;;  %v6101_v57 = vld [vmem:[#allocation71_spill] sm:$0xff] }
 0x4a4   : > { %2723 = vperm.xlu0 %3584, %v2614_v40   ;;  %2672 = vperm.xlu1 %3583, %v2597_v60   ;;  %v2504_v40 = vmul.f32 %v5292_v39, %v6085_v15  ;;  %v6086_v60 = vld [vmem:[#allocation62_spill] sm:$0xff]  ;;  %v2607_v20 = vsel %vm2543_vm10, 1, %v6057_v2  ;;  %vm2563_vm13 = vcmp.gt.f32.partialorder %v2498_v10, 0.5  ;;  %vm2549_vm10 = vcmp.gt.f32.partialorder %v2484_v32, 0.5  ;;  %v6102_v7 = vld [vmem:[#allocation67_spill] sm:$0xff] }
 0x4a5   : > { %v2480_v25 = vmul.f32 %v5215_v26, %v6086_v60  ;;  %v2627_v29 = vsel %vm2563_vm13, 1, %v6057_v2  ;;  %v2613_v4 = vsel %vm2549_vm10, 1, %v6057_v2  ;;  %v2519_v56 = vmul.f32 %v5350_v11, %v6101_v57 }
 0x4a6   : > { %vm2569_vm11 = vcmp.gt.f32.partialorder %v2504_v40, 0.5  ;;  %v6103_v40 = vld [vmem:[#allocation45_spill] sm:$0xff] }
 0x4a7   : > { %vm2545_vm12 = vcmp.gt.f32.partialorder %v2480_v25, 0.5  ;;  %v2633_v47 = vsel %vm2569_vm11, 1, %v6057_v2  ;;  %v2520_v60 = vmul.f32 %v5350_v11, %v6103_v40  ;;  %v6104_v25 = vld [vmem:[#allocation25_spill] sm:$0xff] }
 0x4a8   : > { %2729 = vperm.xlu0 %3584, %v2616_v50   ;;  %2675 = vperm.xlu1 %3583, %v2598_v52   ;;  %v6088_v50 = vld [vmem:[#allocation63_spill] sm:$0xff]  ;;  %v2609_v46 = vsel %vm2545_vm12, 1, %v6057_v2 }
 0x4a9   : > { %v2482_v52 = vmul.f32 %v5215_v26, %v6088_v50  ;;  %v6106_v50 = vld [vmem:[#allocation32_spill] sm:$0xff] }
 0x4ab   : > { %vm2547_vm14 = vcmp.gt.f32.partialorder %v2482_v52, 0.5  ;;  %v2507_v52 = vmul.f32 %v5292_v39, %v6106_v50 }
 0x4ac   : > { %2735 = vperm.xlu0 %3584, %v2618_v31   ;;  %2678 = vperm.xlu1 %3583, %v2599_v1   ;;  %v6090_v31 = vld [vmem:[#allocation24_spill] sm:$0xff]  ;;  %v2611_v6 = vsel %vm2547_vm14, 1, %v6057_v2 }
 0x4ad   : > { %v2505_v1 = vmul.f32 %v5292_v39, %v6090_v31  ;;  %v2514_v31 = vmul.f32 %v5321_v42, %v6107_v53 }
 0x4af   : > { %vm2570_vm9 = vcmp.gt.f32.partialorder %v2505_v1, 0.5  ;;  %v6108_v1 = vld [vmem:[#allocation72_spill] sm:$0xff] }
 0x4b0   : > { %2741 = vperm.xlu0 %3584, %v2620_v44   ;;  %2684 = vperm.xlu1 %3583, %v2601_v24   ;;  %v2511_v44 = vmul.f32 %v5321_v42, %v6092_v33  ;;  %v6093_v24 = vld [vmem:[#allocation64_spill] sm:$0xff]  ;;  %v2634_v61 = vsel %vm2570_vm9, 1, %v6057_v2  ;;  %v2521_v16 = vmul.f32 %v5350_v11, %v6108_v1 }
 0x4b1   : > { %v2486_v3 = vmul.f32 %v5215_v26, %v6093_v24  ;;  %v6096_v26 = vld [vmem:[#allocation21_spill] sm:$0xff] }
 0x4b2   : > { %vm2576_vm11 = vcmp.gt.f32.partialorder %v2511_v44, 0.5  ;;  %v2499_v63 = vmul.f32 %v5269_v13, %v6096_v26  ;;  %v6110_v44 = vld [vmem:[#allocation33_spill] sm:$0xff] }
 0x4b3   : > { %vm2551_vm12 = vcmp.gt.f32.partialorder %v2486_v3, 0.5  ;;  %v2640_v5 = vsel %vm2576_vm11, 1, %v6057_v2  ;;  %v2508_v24 = vmul.f32 %v5292_v39, %v6110_v44 }
 0x4b4   : > { %2747 = vperm.xlu0 %3584, %v2622_v48   ;;  %2687 = vperm.xlu1 %3583, %v2602_v9   ;;  %v2512_v48 = vmul.f32 %v5321_v42, %v6094_v14  ;;  %v6095_v9 = vld [vmem:[#allocation44_spill] sm:$0xff]  ;;  %v2615_v62 = vsel %vm2551_vm12, 1, %v6057_v2  ;;  %vm2564_vm9 = vcmp.gt.f32.partialorder %v2499_v63, 0.5  ;;  %v6114_v63 = vld [vmem:[#allocation30_spill] sm:$0xff] }
 0x4b5   : > { %v2488_v41 = vmul.f32 %v5243_v21, %v6095_v9  ;;  %v2628_v23 = vsel %vm2564_vm9, 1, %v6057_v2  ;;  %vm2585_vm9 = vcmp.gt.f32.partialorder %v2520_v60, 0.5 }
 0x4b6   : > { %vm2577_vm13 = vcmp.gt.f32.partialorder %v2512_v48, 0.5  ;;  %v6112_v48 = vld [vmem:[#allocation77_spill] sm:$0xff] }
 0x4b7   : > { %vm2553_vm14 = vcmp.gt.f32.partialorder %v2488_v41, 0.5  ;;  %v2641_v28 = vsel %vm2577_vm13, 1, %v6057_v2  ;;  %vm2584_vm13 = vcmp.gt.f32.partialorder %v2519_v56, 0.5  ;;  %v2522_v9 = vmul.f32 %v5350_v11, %v6112_v48 }
 0x4b8   : > { %2753 = vperm.xlu0 %3584, %v2624_v49   ;;  %2690 = vperm.xlu1 %3583, %v2603_v22   ;;  %v6097_v49 = vld [vmem:[#allocation65_spill] sm:$0xff]  ;;  %v2617_v17 = vsel %vm2553_vm14, 1, %v6057_v2 }
 0x4b9   : > { %v2490_v22 = vmul.f32 %v5243_v21, %v6097_v49  ;;  %v2509_v49 = vmul.f32 %v5292_v39, %v6114_v63 }
 0x4bb   : > { %vm2555_vm10 = vcmp.gt.f32.partialorder %v2490_v22, 0.5 }
 0x4bc   : > { %2756 = vperm.xlu0 %3584, %v2625_v0   ;;  %2693 = vperm.xlu1 %3583, %v2604_v38   ;;  %v2513_v0 = vmul.f32 %v5321_v42, %v6099_v19  ;;  %v6100_v38 = vld [vmem:[#allocation66_spill] sm:$0xff]  ;;  %v2619_v59 = vsel %vm2555_vm10, 1, %v6057_v2  ;;  %v6116_v19 = vld [vmem:[#allocation73_spill] sm:$0xff] }
 0x4bd   : > { %v2492_v51 = vmul.f32 %v5243_v21, %v6100_v38 }
 0x4be   : > { %vm2578_vm11 = vcmp.gt.f32.partialorder %v2513_v0, 0.5  ;;  %v2523_v0 = vmul.f32 %v5350_v11, %v6116_v19 }
 0x4bf   : > { %vm2557_vm12 = vcmp.gt.f32.partialorder %v2492_v51, 0.5  ;;  %v6117_v51 = vld [vmem:[#allocation31_spill] sm:$0xff] }
 0x4c0   : > { %2759 = vperm.xlu0 %3584, %v2626_v55   ;;  %2696 = vperm.xlu1 %3583, %v2605_v43   ;;  %v2494_v55 = vmul.f32 %v5243_v21, %v6102_v7  ;;  %v2642_v43 = vsel %vm2578_vm11, 1, %v6057_v2  ;;  %v2621_v15 = vsel %vm2557_vm12, 1, %v6057_v2  ;;  %v6105_v21 = vld [vmem:[#allocation22_spill] sm:$0xff]  ;;  %vm2572_vm12 = vcmp.gt.f32.partialorder %v2507_v52, 0.5 }
 0x4c1   : > { %v2500_v10 = vmul.f32 %v5269_v13, %v6105_v21  ;;  %v5422_v21 = vpop.xlane.xlu1 %3181 }
 0x4c2   : > { %vm2559_vm14 = vcmp.gt.f32.partialorder %v2494_v55, 0.5  ;;  %v6119_v55 = vld [vmem:[#allocation78_spill] sm:$0xff]  ;;  %v3183_v44 = vsub.f32 %v5198_v45, %v5422_v21 }
 0x4c3   : > { %v2623_v12 = vsel %vm2559_vm14, 1, %v6057_v2  ;;  %vm2565_vm11 = vcmp.gt.f32.partialorder %v2500_v10, 0.5  ;;  %vm2586_vm14 = vcmp.gt.f32.partialorder %v2521_v16, 0.5 }
 0x4c4   : > { %2777 = vperm.xlu0 %3584, %v2632_v36   ;;  %2702 = vperm.xlu1 %3583, %v2607_v20   ;;  %v2506_v36 = vmul.f32 %v5292_v39, %v6104_v25  ;;  %v2648_v20 = vsel %vm2584_vm13, 1, %v6057_v2  ;;  %v2629_v32 = vsel %vm2565_vm11, 1, %v6057_v2  ;;  %vm2579_vm13 = vcmp.gt.f32.partialorder %v2514_v31, 0.5  ;;  %v6121_v25 = vld [vmem:[#allocation74_spill] sm:$0xff] }
 0x4c5   : > { %v2643_v3 = vsel %vm2579_vm13, 1, %v6057_v2 }
 0x4c6   : > { %vm2571_vm10 = vcmp.gt.f32.partialorder %v2506_v36, 0.5  ;;  %v2525_v36 = vmul.f32 %v5350_v11, %v6121_v25 }
 0x4c8   : > { %2780 = vperm.xlu0 %3584, %v2633_v47   ;;  %2708 = vperm.xlu1 %3583, %v2609_v46   ;;  %v2649_v47 = vsel %vm2585_vm9, 1, %v6057_v2  ;;  %v2635_v46 = vsel %vm2571_vm10, 1, %v6057_v2  ;;  %vm2573_vm10 = vcmp.gt.f32.partialorder %v2508_v24, 0.5 }
 0x4cc   : > { %2762 = vperm.xlu0 %3584, %v2627_v29   ;;  %2714 = vperm.xlu1 %3583, %v2611_v6   ;;  %v2636_v29 = vsel %vm2572_vm12, 1, %v6057_v2  ;;  %v6109_v6 = vld [vmem:[#allocation17_spill] sm:$0xff]  ;;  %vm2587_vm12 = vcmp.gt.f32.partialorder %v2522_v9, 0.5 }
 0x4cd   : > { %v2501_v33 = vmul.f32 %v5269_v13, %v6109_v6 }
 0x4cf   : > { %vm2566_vm9 = vcmp.gt.f32.partialorder %v2501_v33, 0.5 }
 0x4d0   : > { %2783 = vperm.xlu0 %3584, %v2634_v61   ;;  %2720 = vperm.xlu1 %3583, %v2613_v4   ;;  %v2650_v61 = vsel %vm2586_vm14, 1, %v6057_v2  ;;  %v6111_v4 = vld [vmem:[#allocation69_spill] sm:$0xff]  ;;  %v2630_v41 = vsel %vm2566_vm9, 1, %v6057_v2  ;;  %vm2574_vm14 = vcmp.gt.f32.partialorder %v2509_v49, 0.5 }
 0x4d1   : > { %v2515_v14 = vmul.f32 %v5321_v42, %v6111_v4 }
 0x4d3   : > { %vm2580_vm11 = vcmp.gt.f32.partialorder %v2515_v14, 0.5  ;;  %v3184_v14 = vmul.f32 1.442695, %v3183_v44 }
 0x4d4   : > { %2801 = vperm.xlu0 %3584, %v2640_v5   ;;  %2726 = vperm.xlu1 %3583, %v2615_v62   ;;  %v2637_v5 = vsel %vm2573_vm10, 1, %v6057_v2  ;;  %v6113_v62 = vld [vmem:[#allocation18_spill] sm:$0xff]  ;;  %v2644_v22 = vsel %vm2580_vm11, 1, %v6057_v2  ;;  %vm2588_vm10 = vcmp.gt.f32.partialorder %v2523_v0, 0.5 }
 0x4d5   : > { %v2502_v26 = vmul.f32 %v5269_v13, %v6113_v62  ;;  %v2638_v13 = vsel %vm2574_vm14, 1, %v6057_v2  ;;  %v2652_v7 = vsel %vm2588_vm10, 1, %v6057_v2  ;;  %3627 = vpow2.f32 %v3184_v14 }
 0x4d7   : > { %vm2567_vm13 = vcmp.gt.f32.partialorder %v2502_v26, 0.5 }
 0x4d8   : > { %2804 = vperm.xlu0 %3584, %v2641_v28   ;;  %2732 = vperm.xlu1 %3583, %v2617_v17   ;;  %v2651_v28 = vsel %vm2587_vm12, 1, %v6057_v2  ;;  %v6115_v17 = vld [vmem:[#allocation43_spill] sm:$0xff]  ;;  %v2631_v38 = vsel %vm2567_vm13, 1, %v6057_v2 }
 0x4d9   : > { %v2516_v8 = vmul.f32 %v5321_v42, %v6115_v17 }
 0x4db   : > { %vm2581_vm9 = vcmp.gt.f32.partialorder %v2516_v8, 0.5 }
 0x4dc   : > { %2765 = vperm.xlu0 %3584, %v2628_v23   ;;  %2738 = vperm.xlu1 %3583, %v2619_v59   ;;  %v2510_v23 = vmul.f32 %v5292_v39, %v6117_v51  ;;  %v6118_v59 = vld [vmem:[#allocation70_spill] sm:$0xff]  ;;  %v2645_v56 = vsel %vm2581_vm9, 1, %v6057_v2  ;;  %vm2590_vm9 = vcmp.gt.f32.partialorder %v2525_v36, 0.5 }
 0x4dd   : > { %v2517_v57 = vmul.f32 %v5321_v42, %v6118_v59 }
 0x4de   : > { %vm2575_vm11 = vcmp.gt.f32.partialorder %v2510_v23, 0.5 }
 0x4df   : > { %vm2582_vm12 = vcmp.gt.f32.partialorder %v2517_v57, 0.5  ;;  %v2639_v39 = vsel %vm2575_vm11, 1, %v6057_v2  ;;  %vm6125_vm11 = vcmask 1045509  }
 0x4e0   : > { %2807 = vperm.xlu0 %3584, %v2642_v43   ;;  %2744 = vperm.xlu1 %3583, %v2621_v15   ;;  %v2524_v43 = vmul.f32 %v5350_v11, %v6119_v55  ;;  %v6120_v15 = vld [vmem:[#allocation76_spill] sm:$0xff]  ;;  %v2646_v60 = vsel %vm2582_vm12, 1, %v6057_v2 }
 0x4e1   : > { %v2518_v40 = vmul.f32 %v5321_v42, %v6120_v15 }
 0x4e2   : > { %vm2589_vm13 = vcmp.gt.f32.partialorder %v2524_v43, 0.5  ;;  %v3628_v59 = vpop.eup %3627 }
 0x4e3   : > { %vm2583_vm14 = vcmp.gt.f32.partialorder %v2518_v40, 0.5  ;;  %v2653_v10 = vsel %vm2589_vm13, 1, %v6057_v2  ;;  %v3186_v15 = vsel %vm3179_vm15, %v3628_v59, 0.0 }
 0x4e4   : > { %2825 = vperm.xlu0 %3584, %v2648_v20   ;;  %2750 = vperm.xlu1 %3583, %v2623_v12   ;;  %v6122_v20 = vld [vmem:[#allocation79_spill] sm:$0xff]  ;;  %v2647_v42 = vsel %vm2583_vm14, 1, %v6057_v2  ;;  %vm6129_vm14 = vcmask 523264  }
 0x4e5   : > { %v2526_v12 = vmul.f32 %v5350_v11, %v6122_v20 }
 0x4e7   : > { %vm2591_vm10 = vcmp.gt.f32.partialorder %v2526_v12, 0.5 }
 0x4e8   : > { %2828 = vperm.xlu0 %3584, %v2649_v47   ;;  %2786 = vperm.xlu1 %3583, %v2635_v46   ;;  %v2654_v47 = vsel %vm2590_vm9, 1, %v6057_v2  ;;  %v2655_v11 = vsel %vm2591_vm10, 1, %v6057_v2  ;;  %v5432_v46 = vld [vmem:[%s326_s7] sm:$0xff] }
 0x4ec   : > { %2768 = vperm.xlu0 %3584, %v2629_v32   ;;  %2789 = vperm.xlu1 %3583, %v2636_v29  }
 0x4f0   : > { %2810 = vperm.xlu0 %3584, %v2643_v3   ;;  %2831 = vperm.xlu1 %3583, %v2650_v61  }
 0x4f4   : > { %2771 = vperm.xlu0 %3584, %v2630_v41   ;;  %2792 = vperm.xlu1 %3583, %v2637_v5  }
 0x4f8   : > { %2813 = vperm.xlu0 %3584, %v2644_v22   ;;  %2834 = vperm.xlu1 %3583, %v2651_v28  }
 0x4fc   : > { %2774 = vperm.xlu0 %3584, %v2631_v38   ;;  %2795 = vperm.xlu1 %3583, %v2638_v13  }
 0x500   : > { %2816 = vperm.xlu0 %3584, %v2645_v56   ;;  %2837 = vperm.xlu1 %3583, %v2652_v7  }
 0x504   : > { %2798 = vperm.xlu0 %3584, %v2639_v39   ;;  %2819 = vperm.xlu1 %3583, %v2646_v60  }
 0x508   : > { %2840 = vperm.xlu0 %3584, %v2653_v10   ;;  %2822 = vperm.xlu1 %3583, %v2647_v42  }
 0x50b   : > { %v2682_v50 = vpop.permute.xlu0 %2681  ;;  %v2658_v52 = vpop.permute.xlu1 %2657 }
 0x50c   : > { %2843 = vperm.xlu0 %3584, %v2654_v47   ;;  %2846 = vperm.xlu1 %3583, %v2655_v11   ;;  %v2851_v1 = vrot.slane %v2658_v52, %v6041_v54  ;;  %v2890_v57 = vrot.slane %v2682_v50, %v6041_v54 }
 0x50f   : > { %v5434_v53 = vpop.permute.xlu0 %2699  ;;  %v2661_v31 = vpop.permute.xlu1 %2660 }
 0x510   : > { %v2855_v16 = vrot.slane %v2661_v31, %v6039_v37  ;;  %3193 = vperm.xlu0 %3584, %v5432_v46  }
 0x512   : > { %v2856_v32 = vsel %vm1400_vm0, %v2855_v16, %v2851_v1 }
 0x513   : > { %v5440_v29 = vpop.permute.xlu0 %2705  ;;  %v2664_v6 = vpop.permute.xlu1 %2663 }
 0x514   : > { %v2860_v2 = vrot.slane %v2664_v6, %v6043_v35  ;;  %v2919_v6 = vrot.slane %v5434_v53, %v4192_v18  ;;  %v2929_v53 = vrot.slane %v5440_v29, %v6041_v54 }
 0x516   : > { %v2861_v33 = vsel %vm1407_vm1, %v2860_v2, %v2856_v32 }
 0x517   : > { %v5446_v24 = vpop.permute.xlu0 %2711  ;;  %v2667_v3 = vpop.permute.xlu1 %2666 }
 0x518   : > { %v2865_v61 = vrot.slane %v2667_v3, %v4162_v34 }
 0x51a   : > { %v2866_v4 = vsel %vm1414_vm2, %v2865_v61, %v2861_v33 }
 0x51b   : > { %v5450_v48 = vpop.permute.xlu0 %2717  ;;  %v2670_v9 = vpop.permute.xlu1 %2669 }
 0x51c   : > { %v2870_v41 = vrot.slane %v2670_v9, %v6044_v58 }
 0x51e   : > { %v2871_v5 = vsel %vm1421_vm3, %v2870_v41, %v2866_v4 }
 0x51f   : > { %v5454_v62 = vpop.permute.xlu0 %2723  ;;  %v2673_v26 = vpop.permute.xlu1 %2672 }
 0x520   : > { %v2875_v63 = vrot.slane %v2673_v26, %v4198_v30 }
 0x522   : > { %v2876_v49 = vsel %vm1428_vm4, %v2875_v63, %v2871_v5  ;;  %v2938_v63 = vrot.slane %v5446_v24, %v6043_v35 }
 0x523   : > { %v5458_v22 = vpop.permute.xlu0 %2729  ;;  %v2676_v28 = vpop.permute.xlu1 %2675 }
 0x524   : > { %v2880_v17 = vrot.slane %v2676_v28, %v4192_v18 }
 0x526   : > { %v2881_v8 = vsel %vm1435_vm5, %v2880_v17, %v2876_v49 }
 0x527   : > { %v5462_v19 = vpop.permute.xlu0 %2735  ;;  %v2679_v0 = vpop.permute.xlu1 %2678 }
 0x528   : > { %v2885_v38 = vrot.slane %v2679_v0, %v4240_v27 }
 0x52a   : > { %v2886_v13 = vsel %vm1442_vm6, %v2885_v38, %v2881_v8  ;;  %v2948_v38 = vrot.slane %v5450_v48, %v6044_v58 }
 0x52b   : > { %v5466_v51 = vpop.permute.xlu0 %2741  ;;  %v2685_v23 = vpop.permute.xlu1 %2684 }
 0x52c   : > { %v2894_v56 = vrot.slane %v2685_v23, %v6039_v37 }
 0x52e   : > { %v2895_v7 = vsel %vm1400_vm0, %v2894_v56, %v2890_v57  ;;  %v2958_v57 = vrot.slane %v5454_v62, %v4192_v18 }
 0x52f   : > { %v5471_v55 = vpop.permute.xlu0 %2747  ;;  %v2688_v43 = vpop.permute.xlu1 %2687 }
 0x530   : > { %v2899_v40 = vrot.slane %v2688_v43, %v6043_v35  ;;  %3187 = vadd.xlane.f32.xlu1 %v3186_v15 }
 0x532   : > { %v2900_v39 = vsel %vm1407_vm1, %v2899_v40, %v2895_v7 }
 0x533   : > { %v2754_v60 = vpop.permute.xlu0 %2753  ;;  %v2691_v25 = vpop.permute.xlu1 %2690 }
 0x534   : > { %v2904_v36 = vrot.slane %v2691_v25, %v4162_v34  ;;  %v3007_v42 = vrot.slane %v2754_v60, %v6041_v54 }
 0x536   : > { %v2905_v20 = vsel %vm1414_vm2, %v2904_v36, %v2900_v39  ;;  %v2968_v36 = vrot.slane %v5458_v22, %v6041_v54 }
 0x537   : > { %v2757_v12 = vpop.permute.xlu0 %2756  ;;  %v2694_v10 = vpop.permute.xlu1 %2693 }
 0x538   : > { %v3011_v50 = vrot.slane %v2757_v12, %v6039_v37  ;;  %v2909_v52 = vrot.slane %v2694_v10, %v6044_v58 }
 0x53a   : > { %v3012_v47 = vsel %vm1400_vm0, %v3011_v50, %v3007_v42  ;;  %v2910_v11 = vsel %vm1421_vm3, %v2909_v52, %v2905_v20  ;;  %v2977_v20 = vrot.slane %v5462_v19, %v6043_v35  ;;  %v2997_v19 = vrot.slane %v5471_v55, %v4192_v18 }
 0x53b   : > { %v2760_v31 = vpop.permute.xlu0 %2759  ;;  %v2697_v1 = vpop.permute.xlu1 %2696 }
 0x53c   : > { %v3016_v16 = vrot.slane %v2760_v31, %v6043_v35  ;;  %v2914_v32 = vrot.slane %v2697_v1, %v4198_v30 }
 0x53e   : > { %v5488_v2 = vsel %vm1407_vm1, %v3016_v16, %v3012_v47  ;;  %v2915_v33 = vsel %vm1428_vm4, %v2914_v32, %v2910_v11  ;;  %v2987_v47 = vrot.slane %v5466_v51, %v6044_v58 }
 0x53f   : > { %v5491_v44 = vpop.permute.xlu0 %2777  ;;  %v2920_v3 = vsel %vm1435_vm5, %v2919_v6, %v2915_v33  ;;  %v2703_v61 = vpop.permute.xlu1 %2702 }
 0x540   : > { %v2924_v4 = vrot.slane %v2703_v61, %v4240_v27 }
 0x542   : > { %v2925_v14 = vsel %vm1442_vm6, %v2924_v4, %v2920_v3 }
 0x543   : > { %v3160_v9 = vsel %vm1717_vm7, %v2925_v14, %v2886_v13  ;;  %v5497_v41 = vpop.permute.xlu0 %2780  ;;  %v2709_v5 = vpop.permute.xlu1 %2708  ;;  %vm6123_vm7 = vcmask 1043459  }
 0x544   : > { %v2933_v26 = vrot.slane %v2709_v5, %v6039_v37 }
 0x546   : > { %v2934_v49 = vsel %vm1400_vm0, %v2933_v26, %v2929_v53 }
 0x547   : > { %v2763_v28 = vpop.permute.xlu0 %2762  ;;  %v2939_v17 = vsel %vm1407_vm1, %v2938_v63, %v2934_v49  ;;  %v2715_v8 = vpop.permute.xlu1 %2714 }
 0x548   : > { %v2943_v0 = vrot.slane %v2715_v8, %v4162_v34 }
 0x54a   : > { %v2944_v13 = vsel %vm1414_vm2, %v2943_v0, %v2939_v17  ;;  %v3021_v17 = vrot.slane %v2763_v28, %v4162_v34 }
 0x54b   : > { %v5510_v23 = vpop.permute.xlu0 %2783  ;;  %v2949_v29 = vsel %vm1421_vm3, %v2948_v38, %v2944_v13  ;;  %v2721_v59 = vpop.permute.xlu1 %2720 }
 0x54c   : > { %v2953_v24 = vrot.slane %v2721_v59, %v4198_v30  ;;  %v3022_v59 = vsel %vm1414_vm2, %v3021_v17, %v5488_v2 }
 0x54e   : > { %v2954_v56 = vsel %vm1428_vm4, %v2953_v24, %v2949_v29 }
 0x54f   : > { %v5517_v7 = vpop.permute.xlu0 %2801  ;;  %v2959_v43 = vsel %vm1435_vm5, %v2958_v57, %v2954_v56  ;;  %v2727_v15 = vpop.permute.xlu1 %2726 }
 0x550   : > { %v2963_v48 = vrot.slane %v2727_v15, %v4240_v27 }
 0x552   : > { %v2964_v40 = vsel %vm1442_vm6, %v2963_v48, %v2959_v43  ;;  %v3050_v43 = vrot.slane %v5497_v41, %v6039_v37  ;;  %v3055_v48 = vrot.slane %v5510_v23, %v6043_v35 }
 0x553   : > { %v3161_v39 = vsel %vm1719_vm8, %v2964_v40, %v3160_v9  ;;  %v5523_v60 = vpop.permute.xlu0 %2804  ;;  %v2733_v25 = vpop.permute.xlu1 %2732  ;;  %vm6124_vm8 = vcmask 1044484  }
 0x554   : > { %v2972_v62 = vrot.slane %v2733_v25, %v6039_v37 }
 0x556   : > { %v2973_v12 = vsel %vm1400_vm0, %v2972_v62, %v2968_v36 }
 0x557   : > { %v2766_v10 = vpop.permute.xlu0 %2765  ;;  %v2978_v42 = vsel %vm1407_vm1, %v2977_v20, %v2973_v12  ;;  %v2739_v50 = vpop.permute.xlu1 %2738 }
 0x558   : > { %v2982_v52 = vrot.slane %v2739_v50, %v4162_v34  ;;  %v3026_v8 = vrot.slane %v2766_v10, %v6044_v58 }
 0x55a   : > { %v2983_v11 = vsel %vm1414_vm2, %v2982_v52, %v2978_v42  ;;  %v3027_v24 = vsel %vm1421_vm3, %v3026_v8, %v3022_v59  ;;  %v3089_v42 = vrot.slane %v5523_v60, %v6039_v37 }
 0x55b   : > { %v2808_v31 = vpop.permute.xlu0 %2807  ;;  %v2988_v22 = vsel %vm1421_vm3, %v2987_v47, %v2983_v11  ;;  %v2745_v1 = vpop.permute.xlu1 %2744  ;;  %v3085_v47 = vrot.slane %v5517_v7, %v6041_v54 }
 0x55c   : > { %v2992_v16 = vrot.slane %v2745_v1, %v4198_v30  ;;  %v3094_v50 = vrot.slane %v2808_v31, %v6043_v35 }
 0x55d   : > { %v3090_v60 = vsel %vm1400_vm0, %v3089_v42, %v3085_v47 }
 0x55e   : > { %v2993_v32 = vsel %vm1428_vm4, %v2992_v16, %v2988_v22  ;;  %v3095_v7 = vsel %vm1407_vm1, %v3094_v50, %v3090_v60 }
 0x55f   : > { %v5541_v6 = vpop.permute.xlu0 %2825  ;;  %v2998_v33 = vsel %vm1435_vm5, %v2997_v19, %v2993_v32  ;;  %v2751_v3 = vpop.permute.xlu1 %2750 }
 0x560   : > { %v3002_v51 = vrot.slane %v2751_v3, %v4240_v27 }
 0x562   : > { %v3003_v61 = vsel %vm1442_vm6, %v3002_v51, %v2998_v33 }
 0x563   : > { %v3162_v4 = vsel %vm6123_vm7, %v3003_v61, %v3161_v39  ;;  %v5547_v14 = vpop.permute.xlu0 %2828  ;;  %v2787_v9 = vpop.permute.xlu1 %2786  ;;  %v3046_v39 = vrot.slane %v5491_v44, %v6041_v54 }
 0x564   : > { %v3060_v2 = vrot.slane %v2787_v9, %v4162_v34  ;;  %v3128_v31 = vrot.slane %v5547_v14, %v6039_v37  ;;  %v3124_v9 = vrot.slane %v5541_v6, %v6041_v54 }
 0x565   : > { %v3051_v12 = vsel %vm1400_vm0, %v3050_v43, %v3046_v39 }
 0x566   : > { %v3056_v23 = vsel %vm1407_vm1, %v3055_v48, %v3051_v12 }
 0x567   : > { %v2769_v5 = vpop.permute.xlu0 %2768  ;;  %v2790_v53 = vpop.permute.xlu1 %2789  ;;  %v3061_v52 = vsel %vm1414_vm2, %v3060_v2, %v3056_v23 }
 0x568   : > { %v3031_v13 = vrot.slane %v2769_v5, %v4198_v30  ;;  %v3065_v36 = vrot.slane %v2790_v53, %v6044_v58 }
 0x56a   : > { %v3032_v28 = vsel %vm1428_vm4, %v3031_v13, %v3027_v24  ;;  %v3066_v11 = vsel %vm1421_vm3, %v3065_v36, %v3061_v52 }
 0x56b   : > { %v2811_v26 = vpop.permute.xlu0 %2810  ;;  %v2832_v55 = vpop.permute.xlu1 %2831 }
 0x56c   : > { %v3099_v16 = vrot.slane %v2811_v26, %v4162_v34  ;;  %v3133_v51 = vrot.slane %v2832_v55, %v6043_v35  ;;  %v3129_v55 = vsel %vm1400_vm0, %v3128_v31, %v3124_v9 }
 0x56f   : > { %v2772_v63 = vpop.permute.xlu0 %2771  ;;  %v2793_v49 = vpop.permute.xlu1 %2792 }
 0x570   : > { %v3036_v29 = vrot.slane %v2772_v63, %v4192_v18  ;;  %v3070_v10 = vrot.slane %v2793_v49, %v4198_v30  ;;  %v3100_v63 = vsel %vm1414_vm2, %v3099_v16, %v3095_v7 }
 0x572   : > { %v3037_v40 = vsel %vm1435_vm5, %v3036_v29, %v3032_v28  ;;  %v3071_v19 = vsel %vm1428_vm4, %v3070_v10, %v3066_v11  ;;  %v6126_v28 = vld [vmem:[#allocation34_spill] sm:$0xff] }
 0x573   : > { %v2814_v0 = vpop.permute.xlu0 %2813  ;;  %v2835_v38 = vpop.permute.xlu1 %2834  ;;  %vm2527_vm0 = vcmp.lt.s32.totalorder %v6126_v28, 32 }
 0x574   : > { %v3104_v33 = vrot.slane %v2814_v0, %v6044_v58  ;;  %v3138_v5 = vrot.slane %v2835_v38, %v4162_v34  ;;  %v3134_v34 = vsel %vm1407_vm1, %v3133_v51, %v3129_v55  ;;  %vm6127_vm1 = vcmask 1046534  }
 0x576   : > { %v3105_v17 = vsel %vm1421_vm3, %v3104_v33, %v3100_v63  ;;  %v3139_v8 = vsel %vm1414_vm2, %v3138_v5, %v3134_v34  ;;  %vm6128_vm2 = vcmask 1047559  }
 0x577   : > { %v2775_v57 = vpop.permute.xlu0 %2774  ;;  %v2796_v56 = vpop.permute.xlu1 %2795 }
 0x578   : > { %v3041_v15 = vrot.slane %v2775_v57, %v4240_v27  ;;  %v3075_v44 = vrot.slane %v2796_v56, %v4192_v18 }
 0x57a   : > { %v3042_v25 = vsel %vm1442_vm6, %v3041_v15, %v3037_v40  ;;  %v3076_v3 = vsel %vm1435_vm5, %v3075_v44, %v3071_v19 }
 0x57b   : > { %v3163_v41 = vsel %vm6124_vm8, %v3042_v25, %v3162_v4  ;;  %v2817_v62 = vpop.permute.xlu0 %2816  ;;  %v2838_v20 = vpop.permute.xlu1 %2837 }
 0x57c   : > { %v3109_v61 = vrot.slane %v2817_v62, %v4198_v30  ;;  %v3143_v49 = vrot.slane %v2838_v20, %v6044_v58  ;;  %v3176_v20 = vcvt.s32.f32 %v5432_v46 }
 0x57e   : > { %v3110_v6 = vsel %vm1428_vm4, %v3109_v61, %v3105_v17  ;;  %v3144_v58 = vsel %vm1421_vm3, %v3143_v49, %v3139_v8 }
 0x57f   : > { %v2799_v22 = vpop.permute.xlu0 %2798  ;;  %v2820_v1 = vpop.permute.xlu1 %2819 }
 0x580   : > { %v3080_v32 = vrot.slane %v2799_v22, %v4240_v27  ;;  %v3114_v37 = vrot.slane %v2820_v1, %v4192_v18 }
 0x582   : > { %v3081_v4 = vsel %vm1442_vm6, %v3080_v32, %v3076_v3  ;;  %v3115_v0 = vsel %vm1435_vm5, %v3114_v37, %v3110_v6 }
 0x583   : > { %v3164_v53 = vsel %vm6125_vm11, %v3081_v4, %v3163_v41  ;;  %v2841_v14 = vpop.permute.xlu0 %2840  ;;  %v2823_v26 = vpop.permute.xlu1 %2822 }
 0x584   : > { %v3119_v35 = vrot.slane %v2823_v26, %v4240_v27  ;;  %v3148_v54 = vrot.slane %v2841_v14, %v4198_v30 }
 0x586   : > { %v3120_v29 = vsel %vm1442_vm6, %v3119_v35, %v3115_v0  ;;  %v3149_v30 = vsel %vm1428_vm4, %v3148_v54, %v3144_v58  ;;  %vm3204_vm4 = vcmask 7168  }
 0x587   : > { %v2844_v38 = vpop.permute.xlu0 %2843  ;;  %v2847_v13 = vpop.permute.xlu1 %2846  ;;  %v3165_v15 = vsel %vm6127_vm1, %v3120_v29, %v3164_v53 }
 0x588   : > { %v3153_v59 = vrot.slane %v2844_v38, %v4192_v18  ;;  %v3158_v24 = vrot.slane %v2847_v13, %v4240_v27  ;;  %v3765_v18 = vmov 0.0  }
 0x58a   : > { %v3154_v57 = vsel %vm1435_vm5, %v3153_v59, %v3149_v30 }
 0x58b   : > { %v3159_v56 = vsel %vm1442_vm6, %v3158_v24, %v3154_v57  ;;  %v3194_v43 = vpop.permute.xlu0 %3193 }
 0x58c   : > { %v3166_v48 = vsel %vm6128_vm2, %v3159_v56, %v3165_v15  ;;  %vm3195_vm12 = vcmp.eq.s32.totalorder %v6126_v28, %v3194_v43 }
 0x58d   : > { %vm3167_vm3 = vcmp.ne.s32.totalorder %v3166_v48, 0  ;;  %v3196_v39 = vsel %vm3195_vm12, %v5198_v45, 0.0 }
 0x58e   : > { %vm3168_vm13 = vmand %vm2527_vm0, %vm3167_vm3  ;;  %v3197_v2 = vsel %vm3179_vm15, %v3196_v39, 0.0 }
 0x58f   : > { %v3169_v40 = vsel %vm3168_vm13, 1.0, %v3765_v18 }
 0x590   : > { %v3170_v27 = vsel %vm6129_vm14, %v3169_v40, 0.0 }
 0x591   : > { %3171 = vadd.xlane.f32.xlu0 %v3170_v27 }
 0x595   : > { %3198 = vadd.xlane.f32.xlu0 %v3197_v2 }
 0x5b9   : > { %v3188_v25 = vpop.xlane.xlu1 %3187 }
 0x5ba   : > { %3629 = vlog2.f32 %v3188_v25 }
 0x5c7   : > { %v3630_v36 = vpop.eup %3629 }
 0x5c8   : > { %v3190_v41 = vmul.f32 0.6931472, %v3630_v36 }
 0x5ca   : > { %v3191_v23 = vadd.f32 %v3190_v41, %v5422_v21 }
 0x61a   : > { %v3172_v62 = vpop.xlane.xlu0 %3171 }
 0x61b   : > { %v3173_v12 = vmul.f32 0.03125, %v3172_v62 }
 0x61d   : > { %v3175_v10 = vsub.f32 1.0, %v3173_v12 }
 0x61e   : > { %v3199_v42 = vpop.xlane.xlu0 %3198 }
 0x61f   : > { %v3177_v44 = vmul.f32 %v3176_v20, %v3175_v10  ;;  %v3200_v50 = vsub.f32 %v3191_v23, %v3199_v42 }
 0x621   : > { %v3202_v45 = vmul.f32 0.3, %v3177_v44  ;;  %v3201_v52 = vmul.f32 0.7, %v3200_v50 }
 0x623   : > { %v3203_v47 = vadd.f32 %v3202_v45, %v3201_v52 }
 0x625   : > { %3205 = vst.msk [vmem:[%s330_s30] sm:$0xff] %vm3204_vm4, %v3203_v47 }
 0x626 PF: > { %p16_p6 = scmp.ge.s32.totalorder %s3817_s22, 4   ;;  %s6130_s18 = smov %s3747_s19 }
 0x627   : > { %s6131_s19 = smov %s3751_s20  ;;  %s6132_s20 = smov %s3826_s25 }
 0x628   : > { %s6133_s21 = smov %s3817_s22  ;;  %18 = sbr.rel (!%p16_p6) target bundleno = 4 (0x4), region = 101 }
 0x62d   :  { %3225 = vsyncpa [#allocation3], 1 }
 0x62e   :  { %3227 = vsyncpa [#allocation3 + $0x1], 1 }
 0x62f   :  { %3228 = vsyncpa [#allocation5], 1 }

</bundles_post_ra>
